<compile_context>
chip_gen: v7x
topology: tpu7x:2x2x1
jax: 0.10.0
libtpu: 0.0.40
codegen_flags: <defaults>
</compile_context>

<pallas_src>
import functools
import math

import jax
import jax.numpy as jnp
from jax.experimental import pallas as pl
from jax.experimental.pallas import tpu as pltpu


def _round_up(x, m):
    return (x + m - 1) // m * m


def _sigmoid(x):
    return 1.0 / (1.0 + jnp.exp(-x))


# --------------------------------------------------------------------------
# Generic tiled matmul  y = act((x @ W.T) [* scale] [+ bias])
#   - W is passed in PyTorch (out, in) layout; the wrapper transposes it once
#     to (K, N) so the kernel runs a standard (tm,tk)x(tk,tn) contraction.
#   - f32 VMEM accumulator scratch, pl.when init/finalize on the K axis.
# --------------------------------------------------------------------------
def _matmul_kernel(*refs, relu, has_scale, has_bias):
    x_ref, w_ref = refs[0], refs[1]
    idx = 2
    scale_ref = refs[idx] if has_scale else None
    idx += 1 if has_scale else 0
    bias_ref = refs[idx] if has_bias else None
    idx += 1 if has_bias else 0
    o_ref, acc_ref = refs[idx], refs[idx + 1]

    @pl.when(pl.program_id(2) == 0)
    def _():
        acc_ref[...] = jnp.zeros_like(acc_ref)

    acc_ref[...] += jnp.dot(x_ref[...], w_ref[...],
                            preferred_element_type=jnp.float32)

    @pl.when(pl.program_id(2) == pl.num_programs(2) - 1)
    def _():
        y = acc_ref[...]
        if has_scale:
            y = y * scale_ref[...]
        if has_bias:
            y = y + bias_ref[...]
        if relu:
            y = jnp.maximum(y, 0.0)
        o_ref[...] = y.astype(o_ref.dtype)


def pallas_linear(x, weight, scale=None, bias=None, relu=False,
                  tm_cap=512, tn_cap=512, tk_cap=1024):
    """y = act((x @ weight.T) [* scale] [+ bias]).

    x: (M, K); weight: (N, K) (nn.Linear layout); scale / bias: (N,) or None.
    """
    M, K = x.shape
    N = weight.shape[0]
    has_scale = scale is not None
    has_bias = bias is not None

    # --- tile sizing / padding (avoid K padding when K fits one block) ---
    M_pad8 = _round_up(M, 8)
    if M_pad8 <= tm_cap:
        tm, M_pad = M_pad8, M_pad8
    else:
        tm = tm_cap
        M_pad = _round_up(M, tm)

    N_pad128 = _round_up(N, 128)
    if N_pad128 <= tn_cap:
        tn, N_pad = N_pad128, N_pad128
    else:
        tn = tn_cap
        N_pad = _round_up(N, tn)

    if K <= tk_cap:
        tk, K_pad = K, K          # full-K block (block dim == array dim is legal)
    else:
        tk = tk_cap
        K_pad = _round_up(K, tk)

    xp = x if (M_pad, K_pad) == (M, K) else (
        jnp.zeros((M_pad, K_pad), x.dtype).at[:M, :K].set(x))
    wT = weight.T                                        # (K, N), one-off
    wp = wT if (K_pad, N_pad) == (K, N) else (
        jnp.zeros((K_pad, N_pad), weight.dtype).at[:K, :N].set(wT))

    operands = [xp, wp]
    in_specs = [pl.BlockSpec((tm, tk), lambda i, j, k: (i, k)),
                pl.BlockSpec((tk, tn), lambda i, j, k: (k, j))]
    if has_scale:
        sp = jnp.zeros((1, N_pad), jnp.float32).at[0, :N].set(
            scale.astype(jnp.float32))
        operands.append(sp)
        in_specs.append(pl.BlockSpec((1, tn), lambda i, j, k: (0, j)))
    if has_bias:
        bp = jnp.zeros((1, N_pad), jnp.float32).at[0, :N].set(
            bias.astype(jnp.float32))
        operands.append(bp)
        in_specs.append(pl.BlockSpec((1, tn), lambda i, j, k: (0, j)))

    grid = (M_pad // tm, N_pad // tn, K_pad // tk)

    # VMEM budget for this tiling (double-buffered inputs + output + scratch),
    # with headroom; stays well under v7x's 64 MiB.
    vmem_need = 4 * (2 * (tm * tk + tk * tn + 2 * tn) + 3 * tm * tn)
    vmem_limit = int(min(max(int(vmem_need * 1.5) + (2 << 20), 8 << 20), 48 << 20))

    out = pl.pallas_call(
        functools.partial(_matmul_kernel, relu=relu,
                          has_scale=has_scale, has_bias=has_bias),
        out_shape=jax.ShapeDtypeStruct((M_pad, N_pad), x.dtype),
        grid_spec=pltpu.PrefetchScalarGridSpec(
            num_scalar_prefetch=0,
            grid=grid,
            in_specs=in_specs,
            out_specs=pl.BlockSpec((tm, tn), lambda i, j, k: (i, j)),
            scratch_shapes=[pltpu.VMEM((tm, tn), jnp.float32)],
        ),
        compiler_params=pltpu.CompilerParams(
            dimension_semantics=("parallel", "parallel", "arbitrary"),
            vmem_limit_bytes=vmem_limit),
        cost_estimate=pl.CostEstimate(
            flops=2 * M_pad * N_pad * K_pad,
            transcendentals=0,
            bytes_accessed=4 * (M_pad * K_pad + K_pad * N_pad + M_pad * N_pad)),
    )(*operands)
    if (M_pad, N_pad) != (M, N):
        out = out[:M, :N]
    return out


# --------------------------------------------------------------------------
# GRU recurrence kernel: time-chunked grid, hidden state carried in the
# resident output block, one fused (nb,H)x(H,3H) hidden matmul per step.
# --------------------------------------------------------------------------
def _gru_kernel(gi_ref, w_hh_ref, b_hh_ref, h_ref, *, chunk_t, hidden, unroll):
    @pl.when(pl.program_id(0) == 0)
    def _():
        h_ref[...] = jnp.zeros_like(h_ref)

    w_hh = w_hh_ref[...]        # (H, 3H)  pre-transposed in wrapper
    b_hh = b_hh_ref[...]        # (1, 3H)

    def step(t, h):
        gh = jnp.dot(h, w_hh, preferred_element_type=jnp.float32) + b_hh  # (nb, 3H)
        gi = gi_ref[t]                                                    # (nb, 3H)
        r = _sigmoid(gi[:, :hidden] + gh[:, :hidden])
        z = _sigmoid(gi[:, hidden:2 * hidden] + gh[:, hidden:2 * hidden])
        n = jnp.tanh(gi[:, 2 * hidden:] + r * gh[:, 2 * hidden:])
        return (1.0 - z) * n + z * h

    h = jax.lax.fori_loop(0, chunk_t, step, h_ref[...], unroll=unroll)
    h_ref[...] = h


def pallas_gru(gi, w_hh, b_hh, hidden, nb):
    """gi: (T', nb, 3H) gate inputs (x @ W_ih.T + b_ih); returns final h (nb, H)."""
    t_p = gi.shape[0]
    chunk_t = min(32, t_p)
    # pad the time axis so chunk_t | T_pad; padded steps are exact identities
    # (gi_z = +1e4  ->  z = 1  ->  h_new = h).
    t_pad = _round_up(t_p, chunk_t)
    if t_pad != t_p:
        pad_blk = jnp.zeros((t_pad - t_p, nb, 3 * hidden), jnp.float32)
        pad_blk = pad_blk.at[:, :, hidden:2 * hidden].set(1e4)
        gi = jnp.concatenate([gi, pad_blk], axis=0)

    unroll = 4 if chunk_t % 4 == 0 else (2 if chunk_t % 2 == 0 else 1)
    w_hh_t = w_hh.T                          # (H, 3H)
    b_hh2 = b_hh.reshape(1, 3 * hidden)

    return pl.pallas_call(
        functools.partial(_gru_kernel, chunk_t=chunk_t, hidden=hidden,
                          unroll=unroll),
        out_shape=jax.ShapeDtypeStruct((nb, hidden), jnp.float32),
        grid_spec=pltpu.PrefetchScalarGridSpec(
            num_scalar_prefetch=0,
            grid=(t_pad // chunk_t,),
            in_specs=[
                pl.BlockSpec((chunk_t, nb, 3 * hidden), lambda c: (c, 0, 0)),
                pl.BlockSpec((hidden, 3 * hidden), lambda c: (0, 0)),
                pl.BlockSpec((1, 3 * hidden), lambda c: (0, 0)),
            ],
            out_specs=pl.BlockSpec((nb, hidden), lambda c: (0, 0)),
        ),
        compiler_params=pltpu.CompilerParams(
            dimension_semantics=("arbitrary",)),
    )(gi, w_hh_t, b_hh2)


# --------------------------------------------------------------------------
# Fused STL kernel: tanh(embed) -> Q/K/V projections -> per-head attention,
# all in one pallas_call.  Outputs are lane-dense (nb, units) / (nb, h*n_tok).
# --------------------------------------------------------------------------
def _stl_kernel(enc_ref, embed_ref, wq_ref, wk_ref, wv_ref, o_ref, p_ref,
                *, heads, d_h, n_tok, inv_scale):
    keys = jnp.tanh(embed_ref[...])                                   # (n_tok, d_k)
    q = jnp.dot(enc_ref[...], wq_ref[...],
                preferred_element_type=jnp.float32)                   # (nb, units)
    k = jnp.dot(keys, wk_ref[...], preferred_element_type=jnp.float32)  # (n_tok, units)
    v = jnp.dot(keys, wv_ref[...], preferred_element_type=jnp.float32)  # (n_tok, units)

    o_parts, p_parts = [], []
    for h in range(heads):
        q_h = q[:, h * d_h:(h + 1) * d_h]
        k_h = k[:, h * d_h:(h + 1) * d_h]
        v_h = v[:, h * d_h:(h + 1) * d_h]
        s = jax.lax.dot_general(q_h, k_h, (((1,), (1,)), ((), ())),
                                preferred_element_type=jnp.float32) * inv_scale
        s = s - jnp.max(s, axis=-1, keepdims=True)
        e = jnp.exp(s)
        p = e / jnp.sum(e, axis=-1, keepdims=True)                    # (nb, n_tok)
        o_parts.append(jnp.dot(p, v_h, preferred_element_type=jnp.float32))
        p_parts.append(p)

    o_ref[...] = jnp.concatenate(o_parts, axis=-1).astype(o_ref.dtype)
    p_ref[...] = jnp.concatenate(p_parts, axis=-1).astype(p_ref.dtype)


# --------------------------------------------------------------------------
# Wrapper-side data movement helpers (XLA, not Pallas)
# --------------------------------------------------------------------------
def _im2col_nhwc(x, kh, kw, stride, pad):
    # x: (N, H, W, C) -> (N*H_out*W_out, kh*kw*C); column order = (kh, kw, C).
    n, h, w, c = x.shape
    x_p = jnp.pad(x, ((0, 0), (pad, pad), (pad, pad), (0, 0)))
    h_out = (h - kh + 2 * pad) // stride + 1
    w_out = (w - kw + 2 * pad) // stride + 1
    cols = []
    for dy in range(kh):
        for dx in range(kw):
            patch = jax.lax.slice(
                x_p, (0, dy, dx, 0),
                (n, dy + (h_out - 1) * stride + 1,
                 dx + (w_out - 1) * stride + 1, c),
                (1, stride, stride, 1))
            cols.append(patch)                       # (N, H_out, W_out, C)
    cols = jnp.stack(cols, axis=3)                   # (N, H_out, W_out, kh*kw, C)
    return cols.reshape(n * h_out * w_out, kh * kw * c), h_out, w_out


# --------------------------------------------------------------------------
# GST forward (Pallas path)
# --------------------------------------------------------------------------
def gst_forward(params, mels, cfg):
    nb, t_in, n_mels = mels.shape
    kh, kw = cfg['ref_enc_size']
    stride, pad = cfg['stride'], cfg['pad']
    eps = 1e-5

    # ---- ReferenceEncoder: conv -> (folded) BN -> ReLU, NHWC im2col matmul ----
    x = mels.reshape(nb, t_in, n_mels, 1)                       # NHWC, C=1
    for conv, bn in zip(params['convs'], params['bns']):
        cols, h_out, w_out = _im2col_nhwc(x, kh, kw, stride, pad)
        c_out, c_in = conv['w'].shape[0], conv['w'].shape[1]
        # reorder weight columns to (kh, kw, C_in) to match im2col_nhwc
        w2d = conv['w'].transpose(0, 2, 3, 1).reshape(c_out, kh * kw * c_in)
        bn_scale = bn['gamma'] / jnp.sqrt(bn['var'] + eps)
        bn_shift = bn['beta'] - bn['mean'] * bn_scale
        bias_eff = conv['b'] * bn_scale + bn_shift
        y = pallas_linear(cols, w2d, scale=bn_scale, bias=bias_eff, relu=True)
        x = y.reshape(nb, h_out, w_out, c_out)                  # stays NHWC

    # (N, T', W', C) -> (N, T', W'*C)  (feature order (W', C))
    _, t_p, w_p, c_last = x.shape
    seq = x.reshape(nb, t_p, w_p * c_last)

    # ---- GRU ----
    hdim = cfg['gru_hidden']
    gru = params['gru']
    # reorder w_ih columns from PyTorch (C, W') order to our (W', C) order
    w_ih_r = (gru['w_ih'].reshape(3 * hdim, c_last, w_p)
              .transpose(0, 2, 1).reshape(3 * hdim, w_p * c_last))
    x_gru = seq.transpose(1, 0, 2).reshape(t_p * nb, w_p * c_last)   # time-major
    gi = pallas_linear(x_gru, w_ih_r, bias=gru['b_ih'])              # (T'*N, 3H)
    gi = gi.reshape(t_p, nb, 3 * hdim)

    enc_out = pallas_gru(gi, gru['w_hh'], gru['b_hh'], hdim, nb)     # (N, H)

    # ---- STL: fused style-token multi-head cross attention ----
    stl = params['stl']
    heads = cfg['attn_head']
    units = cfg['token_size']
    d_h = units // heads
    n_tok = cfg['n_style_token']
    d_k = units // heads

    out_flat, p_flat = pl.pallas_call(
        functools.partial(_stl_kernel, heads=heads, d_h=d_h, n_tok=n_tok,
                          inv_scale=1.0 / math.sqrt(d_k)),
        out_shape=(jax.ShapeDtypeStruct((nb, units), jnp.float32),
                   jax.ShapeDtypeStruct((nb, heads * n_tok), jnp.float32)),
    )(enc_out, stl['embed'],
      stl['w_query'].T, stl['w_key'].T, stl['w_value'].T)

    style_embed = out_flat.reshape(nb, 1, units)
    attention_scores = p_flat.reshape(nb, heads * n_tok, 1)
    return style_embed, attention_scores


# --------------------------------------------------------------------------
# Pure-JAX reference (mirrors the PyTorch math) for the correctness check
# --------------------------------------------------------------------------
def gst_reference(params, mels, cfg):
    nb, t_in, n_mels = mels.shape
    stride, pad = cfg['stride'], cfg['pad']
    eps = 1e-5
    x = mels.reshape(nb, 1, t_in, n_mels)
    for conv, bn in zip(params['convs'], params['bns']):
        y = jax.lax.conv_general_dilated(
            x, conv['w'], window_strides=(stride, stride),
            padding=[(pad, pad), (pad, pad)],
            dimension_numbers=('NCHW', 'OIHW', 'NCHW'))
        y = y + conv['b'][None, :, None, None]
        s = bn['gamma'] / jnp.sqrt(bn['var'] + eps)
        t = bn['beta'] - bn['mean'] * s
        x = jnp.maximum(y * s[None, :, None, None] + t[None, :, None, None], 0.0)
    _, c_last, t_p, m_p = x.shape
    seq = x.transpose(0, 2, 1, 3).reshape(nb, t_p, c_last * m_p)

    hdim = cfg['gru_hidden']
    gru = params['gru']
    h = jnp.zeros((nb, hdim), jnp.float32)
    for t in range(t_p):
        gi = seq[:, t] @ gru['w_ih'].T + gru['b_ih']
        gh = h @ gru['w_hh'].T + gru['b_hh']
        r = _sigmoid(gi[:, :hdim] + gh[:, :hdim])
        z = _sigmoid(gi[:, hdim:2 * hdim] + gh[:, hdim:2 * hdim])
        n = jnp.tanh(gi[:, 2 * hdim:] + r * gh[:, 2 * hdim:])
        h = (1.0 - z) * n + z * h
    enc_out = h

    stl = params['stl']
    heads = cfg['attn_head']
    units = cfg['token_size']
    d_h = units // heads
    n_tok = cfg['n_style_token']
    keys = jnp.tanh(stl['embed'])
    q = enc_out @ stl['w_query'].T
    k = keys @ stl['w_key'].T
    v = keys @ stl['w_value'].T
    q_h = q.reshape(nb, heads, d_h).transpose(1, 0, 2)
    k_h = k.reshape(n_tok, heads, d_h).transpose(1, 0, 2)
    v_h = v.reshape(n_tok, heads, d_h).transpose(1, 0, 2)
    s = jnp.einsum('hnd,htd->hnt', q_h, k_h) / math.sqrt(units // heads)
    p = jax.nn.softmax(s, axis=-1)
    o = jnp.einsum('hnt,htd->hnd', p, v_h)
    style_embed = o.transpose(1, 0, 2).reshape(nb, 1, heads * d_h)
    attention_scores = p.transpose(1, 0, 2).reshape(nb, heads * n_tok)[:, :, None]
    return style_embed, attention_scores


# --------------------------------------------------------------------------
# Deterministic parameter init
# --------------------------------------------------------------------------
def _uniform(key, shape, bound):
    return jax.random.uniform(key, shape, jnp.float32, -bound, bound)


def init_gst_params(key, cfg):
    ks = iter(jax.random.split(key, 32))
    kh, kw = cfg['ref_enc_size']
    filters = [1] + list(cfg['conv_filters'])
    convs, bns = [], []
    for i in range(len(cfg['conv_filters'])):
        c_in, c_out = filters[i], filters[i + 1]
        bound = 1.0 / math.sqrt(c_in * kh * kw)
        convs.append({'w': _uniform(next(ks), (c_out, c_in, kh, kw), bound),
                      'b': _uniform(next(ks), (c_out,), bound)})
        bns.append({'gamma': jax.random.uniform(next(ks), (c_out,), jnp.float32, 0.5, 1.5),
                    'beta': 0.1 * jax.random.normal(next(ks), (c_out,), jnp.float32),
                    'mean': jnp.zeros((c_out,), jnp.float32),
                    'var': jnp.ones((c_out,), jnp.float32)})
    # mel-axis size after the conv stack (same formula as calculate_channels)
    l = cfg['n_mel_channels']
    for _ in range(len(cfg['conv_filters'])):
        l = (l - kh + 2 * cfg['pad']) // cfg['stride'] + 1
    gru_in = cfg['conv_filters'][-1] * l
    hdim = cfg['gru_hidden']
    gb = 1.0 / math.sqrt(hdim)
    gru = {'w_ih': _uniform(next(ks), (3 * hdim, gru_in), gb),
           'w_hh': _uniform(next(ks), (3 * hdim, hdim), gb),
           'b_ih': _uniform(next(ks), (3 * hdim,), gb),
           'b_hh': _uniform(next(ks), (3 * hdim,), gb)}
    d_k = cfg['token_size'] // cfg['attn_head']
    units = cfg['token_size']
    stl = {'embed': 0.5 * jax.random.normal(next(ks), (cfg['n_style_token'], d_k), jnp.float32),
           'w_query': _uniform(next(ks), (units, cfg['gru_hidden']),
                               1.0 / math.sqrt(cfg['gru_hidden'])),
           'w_key': _uniform(next(ks), (units, d_k), 1.0 / math.sqrt(d_k)),
           'w_value': _uniform(next(ks), (units, d_k), 1.0 / math.sqrt(d_k))}
    return {'convs': convs, 'bns': bns, 'gru': gru, 'stl': stl}


if __name__ == "__main__":
    cfg = dict(
        n_mel_channels=16,
        conv_filters=[4, 8],
        ref_enc_size=(3, 3),
        stride=2,
        pad=1,
        gru_hidden=32,
        token_size=32,
        attn_head=4,
        n_style_token=8,
    )
    key = jax.random.PRNGKey(0)
    k_param, k_x = jax.random.split(key)
    params = init_gst_params(k_param, cfg)
    mels = jax.random.normal(k_x, (2, 8, cfg['n_mel_channels']), jnp.float32)

    fwd = jax.jit(lambda p, x: gst_forward(p, x, cfg))
    style_embed, attention_scores = fwd(params, mels)
    style_embed = jax.block_until_ready(style_embed)
    attention_scores = jax.block_until_ready(attention_scores)

    se_ref, sc_ref = gst_reference(params, mels, cfg)

    assert style_embed.shape == (2, 1, cfg['token_size'])
    assert attention_scores.shape == (2, cfg['attn_head'] * cfg['n_style_token'], 1)
    assert jnp.allclose(style_embed, se_ref, atol=2e-3, rtol=2e-3)
    assert jnp.allclose(attention_scores, sc_ref, atol=2e-3, rtol=2e-3)

    print("KERNEL_OK")
</pallas_src>

<mosaic_0001>
module attributes {stable_mosaic.version = 11 : i64} {
  func.func @_matmul_kernel(%arg0: i32, %arg1: i32, %arg2: i32, %arg3: memref<64x9xf32, #tpu.memory_space<vmem>>, %arg4: memref<9x128xf32, #tpu.memory_space<vmem>>, %arg5: memref<1x128xf32, #tpu.memory_space<vmem>>, %arg6: memref<1x128xf32, #tpu.memory_space<vmem>>, %arg7: memref<64x128xf32, #tpu.memory_space<vmem>>, %arg8: memref<64x128xf32, #tpu.memory_space<vmem>>) attributes {dimension_semantics = [#tpu.dimension_semantics<parallel>, #tpu.dimension_semantics<parallel>, #tpu.dimension_semantics<arbitrary>], iteration_bounds = array<i64: 1, 1, 1>, scalar_prefetch = 0 : i64, scratch_operands = 1 : i64, tpu.core_type = #tpu.core_type<tc>, window_params = [{transform_indices = @transform_0, window_bounds = array<i64: 64, 9>}, {transform_indices = @transform_1, window_bounds = array<i64: 9, 128>}, {transform_indices = @transform_2, window_bounds = array<i64: 1, 128>}, {transform_indices = @transform_3, window_bounds = array<i64: 1, 128>}, {transform_indices = @transform_4, window_bounds = array<i64: 64, 128>}]} {
    %c0_i32 = arith.constant 0 : i32
    %0 = arith.cmpi eq, %arg2, %c0_i32 : i32
    %1 = arith.extui %0 : i1 to i32
    %c0_i32_0 = arith.constant 0 : i32
    %2 = arith.cmpi ne, %1, %c0_i32_0 : i32
    scf.if %2 {
      %cst_10 = arith.constant 0.000000e+00 : f32
      %12 = vector.broadcast %cst_10 : f32 to vector<64x128xf32>
      %c0_11 = arith.constant 0 : index
      %c0_12 = arith.constant 0 : index
      %13 = vector.load %arg8[%c0_11, %c0_12] : memref<64x128xf32, #tpu.memory_space<vmem>>, vector<64x128xf32>
      tpu.vector_store %arg8[%c0_11, %c0_12], %12 {strides = array<i32>} : memref<64x128xf32, #tpu.memory_space<vmem>>, vector<64x128xf32>,
    } else {
    }
    %c0 = arith.constant 0 : index
    %c0_1 = arith.constant 0 : index
    %3 = vector.load %arg8[%c0, %c0_1] : memref<64x128xf32, #tpu.memory_space<vmem>>, vector<64x128xf32>
    %c0_2 = arith.constant 0 : index
    %c0_3 = arith.constant 0 : index
    %4 = vector.load %arg3[%c0_2, %c0_3] : memref<64x9xf32, #tpu.memory_space<vmem>>, vector<64x9xf32>
    %c0_4 = arith.constant 0 : index
    %c0_5 = arith.constant 0 : index
    %5 = vector.load %arg4[%c0_4, %c0_5] : memref<9x128xf32, #tpu.memory_space<vmem>>, vector<9x128xf32>
    %cst = arith.constant dense<0.000000e+00> : vector<64x128xf32>
    %6 = tpu.matmul %4, %5, %cst {dimension_numbers = #tpu.dot_dimension_numbers<[1], [0], [0], [1], [0, 0, 1, 1], [], []>} : vector<64x9xf32>, vector<9x128xf32>, vector<64x128xf32> -> vector<64x128xf32>
    %7 = arith.addf %3, %6 : vector<64x128xf32>
    %c0_6 = arith.constant 0 : index
    %c0_7 = arith.constant 0 : index
    %8 = vector.load %arg8[%c0_6, %c0_7] : memref<64x128xf32, #tpu.memory_space<vmem>>, vector<64x128xf32>
    tpu.vector_store %arg8[%c0_6, %c0_7], %7 {strides = array<i32>} : memref<64x128xf32, #tpu.memory_space<vmem>>, vector<64x128xf32>,
    %c0_i32_8 = arith.constant 0 : i32
    %9 = arith.cmpi eq, %arg2, %c0_i32_8 : i32
    %10 = arith.extui %9 : i1 to i32
    %c0_i32_9 = arith.constant 0 : i32
    %11 = arith.cmpi ne, %10, %c0_i32_9 : i32
    scf.if %11 {
      %c0_10 = arith.constant 0 : index
      %c0_11 = arith.constant 0 : index
      %12 = vector.load %arg8[%c0_10, %c0_11] : memref<64x128xf32, #tpu.memory_space<vmem>>, vector<64x128xf32>
      %c0_12 = arith.constant 0 : index
      %c0_13 = arith.constant 0 : index
      %13 = vector.load %arg5[%c0_12, %c0_13] : memref<1x128xf32, #tpu.memory_space<vmem>>, vector<1x128xf32>
      %14 = vector.broadcast %13 : vector<1x128xf32> to vector<64x128xf32>
      %15 = arith.mulf %12, %14 : vector<64x128xf32>
      %c0_14 = arith.constant 0 : index
      %c0_15 = arith.constant 0 : index
      %16 = vector.load %arg6[%c0_14, %c0_15] : memref<1x128xf32, #tpu.memory_space<vmem>>, vector<1x128xf32>
      %17 = vector.broadcast %16 : vector<1x128xf32> to vector<64x128xf32>
      %18 = arith.addf %15, %17 : vector<64x128xf32>
      %cst_16 = arith.constant 0.000000e+00 : f32
      %19 = vector.broadcast %cst_16 : f32 to vector<64x128xf32>
      %20 = arith.maximumf %18, %19 : vector<64x128xf32>
      %c0_17 = arith.constant 0 : index
      %c0_18 = arith.constant 0 : index
      %21 = vector.load %arg7[%c0_17, %c0_18] : memref<64x128xf32, #tpu.memory_space<vmem>>, vector<64x128xf32>
      tpu.vector_store %arg7[%c0_17, %c0_18], %20 {strides = array<i32>} : memref<64x128xf32, #tpu.memory_space<vmem>>, vector<64x128xf32>,
    } else {
    }
    return
  }
  func.func @transform_0(%arg0: i32, %arg1: i32, %arg2: i32) -> (i32, i32) {
    %c0_i32 = arith.constant 0 : i32
    return %arg0, %arg2 : i32, i32
  }
  func.func @transform_1(%arg0: i32, %arg1: i32, %arg2: i32) -> (i32, i32) {
    %c0_i32 = arith.constant 0 : i32
    return %arg2, %arg1 : i32, i32
  }
  func.func @transform_2(%arg0: i32, %arg1: i32, %arg2: i32) -> (i32, i32) {
    %c0_i32 = arith.constant 0 : i32
    %c0_i32_0 = arith.constant 0 : i32
    return %c0_i32, %arg1 : i32, i32
  }
  func.func @transform_3(%arg0: i32, %arg1: i32, %arg2: i32) -> (i32, i32) {
    %c0_i32 = arith.constant 0 : i32
    %c0_i32_0 = arith.constant 0 : i32
    return %c0_i32, %arg1 : i32, i32
  }
  func.func @transform_4(%arg0: i32, %arg1: i32, %arg2: i32) -> (i32, i32) {
    %c0_i32 = arith.constant 0 : i32
    return %arg0, %arg1 : i32, i32
  }
}

module attributes {stable_mosaic.version = 11 : i64} {
  func.func @_matmul_kernel(%arg0: i32, %arg1: i32, %arg2: i32, %arg3: memref<16x36xf32, #tpu.memory_space<vmem>>, %arg4: memref<36x128xf32, #tpu.memory_space<vmem>>, %arg5: memref<1x128xf32, #tpu.memory_space<vmem>>, %arg6: memref<1x128xf32, #tpu.memory_space<vmem>>, %arg7: memref<16x128xf32, #tpu.memory_space<vmem>>, %arg8: memref<16x128xf32, #tpu.memory_space<vmem>>) attributes {dimension_semantics = [#tpu.dimension_semantics<parallel>, #tpu.dimension_semantics<parallel>, #tpu.dimension_semantics<arbitrary>], iteration_bounds = array<i64: 1, 1, 1>, scalar_prefetch = 0 : i64, scratch_operands = 1 : i64, tpu.core_type = #tpu.core_type<tc>, window_params = [{transform_indices = @transform_0, window_bounds = array<i64: 16, 36>}, {transform_indices = @transform_1, window_bounds = array<i64: 36, 128>}, {transform_indices = @transform_2, window_bounds = array<i64: 1, 128>}, {transform_indices = @transform_3, window_bounds = array<i64: 1, 128>}, {transform_indices = @transform_4, window_bounds = array<i64: 16, 128>}]} {
    %c0_i32 = arith.constant 0 : i32
    %0 = arith.cmpi eq, %arg2, %c0_i32 : i32
    %1 = arith.extui %0 : i1 to i32
    %c0_i32_0 = arith.constant 0 : i32
    %2 = arith.cmpi ne, %1, %c0_i32_0 : i32
    scf.if %2 {
      %cst_10 = arith.constant 0.000000e+00 : f32
      %12 = vector.broadcast %cst_10 : f32 to vector<16x128xf32>
      %c0_11 = arith.constant 0 : index
      %c0_12 = arith.constant 0 : index
      %13 = vector.load %arg8[%c0_11, %c0_12] : memref<16x128xf32, #tpu.memory_space<vmem>>, vector<16x128xf32>
      tpu.vector_store %arg8[%c0_11, %c0_12], %12 {strides = array<i32>} : memref<16x128xf32, #tpu.memory_space<vmem>>, vector<16x128xf32>,
    } else {
    }
    %c0 = arith.constant 0 : index
    %c0_1 = arith.constant 0 : index
    %3 = vector.load %arg8[%c0, %c0_1] : memref<16x128xf32, #tpu.memory_space<vmem>>, vector<16x128xf32>
    %c0_2 = arith.constant 0 : index
    %c0_3 = arith.constant 0 : index
    %4 = vector.load %arg3[%c0_2, %c0_3] : memref<16x36xf32, #tpu.memory_space<vmem>>, vector<16x36xf32>
    %c0_4 = arith.constant 0 : index
    %c0_5 = arith.constant 0 : index
    %5 = vector.load %arg4[%c0_4, %c0_5] : memref<36x128xf32, #tpu.memory_space<vmem>>, vector<36x128xf32>
    %cst = arith.constant dense<0.000000e+00> : vector<16x128xf32>
    %6 = tpu.matmul %4, %5, %cst {dimension_numbers = #tpu.dot_dimension_numbers<[1], [0], [0], [1], [0, 0, 1, 1], [], []>} : vector<16x36xf32>, vector<36x128xf32>, vector<16x128xf32> -> vector<16x128xf32>
    %7 = arith.addf %3, %6 : vector<16x128xf32>
    %c0_6 = arith.constant 0 : index
    %c0_7 = arith.constant 0 : index
    %8 = vector.load %arg8[%c0_6, %c0_7] : memref<16x128xf32, #tpu.memory_space<vmem>>, vector<16x128xf32>
    tpu.vector_store %arg8[%c0_6, %c0_7], %7 {strides = array<i32>} : memref<16x128xf32, #tpu.memory_space<vmem>>, vector<16x128xf32>,
    %c0_i32_8 = arith.constant 0 : i32
    %9 = arith.cmpi eq, %arg2, %c0_i32_8 : i32
    %10 = arith.extui %9 : i1 to i32
    %c0_i32_9 = arith.constant 0 : i32
    %11 = arith.cmpi ne, %10, %c0_i32_9 : i32
    scf.if %11 {
      %c0_10 = arith.constant 0 : index
      %c0_11 = arith.constant 0 : index
      %12 = vector.load %arg8[%c0_10, %c0_11] : memref<16x128xf32, #tpu.memory_space<vmem>>, vector<16x128xf32>
      %c0_12 = arith.constant 0 : index
      %c0_13 = arith.constant 0 : index
      %13 = vector.load %arg5[%c0_12, %c0_13] : memref<1x128xf32, #tpu.memory_space<vmem>>, vector<1x128xf32>
      %14 = vector.broadcast %13 : vector<1x128xf32> to vector<16x128xf32>
      %15 = arith.mulf %12, %14 : vector<16x128xf32>
      %c0_14 = arith.constant 0 : index
      %c0_15 = arith.constant 0 : index
      %16 = vector.load %arg6[%c0_14, %c0_15] : memref<1x128xf32, #tpu.memory_space<vmem>>, vector<1x128xf32>
      %17 = vector.broadcast %16 : vector<1x128xf32> to vector<16x128xf32>
      %18 = arith.addf %15, %17 : vector<16x128xf32>
      %cst_16 = arith.constant 0.000000e+00 : f32
      %19 = vector.broadcast %cst_16 : f32 to vector<16x128xf32>
      %20 = arith.maximumf %18, %19 : vector<16x128xf32>
      %c0_17 = arith.constant 0 : index
      %c0_18 = arith.constant 0 : index
      %21 = vector.load %arg7[%c0_17, %c0_18] : memref<16x128xf32, #tpu.memory_space<vmem>>, vector<16x128xf32>
      tpu.vector_store %arg7[%c0_17, %c0_18], %20 {strides = array<i32>} : memref<16x128xf32, #tpu.memory_space<vmem>>, vector<16x128xf32>,
    } else {
    }
    return
  }
  func.func @transform_0(%arg0: i32, %arg1: i32, %arg2: i32) -> (i32, i32) {
    %c0_i32 = arith.constant 0 : i32
    return %arg0, %arg2 : i32, i32
  }
  func.func @transform_1(%arg0: i32, %arg1: i32, %arg2: i32) -> (i32, i32) {
    %c0_i32 = arith.constant 0 : i32
    return %arg2, %arg1 : i32, i32
  }
  func.func @transform_2(%arg0: i32, %arg1: i32, %arg2: i32) -> (i32, i32) {
    %c0_i32 = arith.constant 0 : i32
    %c0_i32_0 = arith.constant 0 : i32
    return %c0_i32, %arg1 : i32, i32
  }
  func.func @transform_3(%arg0: i32, %arg1: i32, %arg2: i32) -> (i32, i32) {
    %c0_i32 = arith.constant 0 : i32
    %c0_i32_0 = arith.constant 0 : i32
    return %c0_i32, %arg1 : i32, i32
  }
  func.func @transform_4(%arg0: i32, %arg1: i32, %arg2: i32) -> (i32, i32) {
    %c0_i32 = arith.constant 0 : i32
    return %arg0, %arg1 : i32, i32
  }
}

module attributes {stable_mosaic.version = 11 : i64} {
  func.func @_stl_kernel(%arg0: memref<2x32xf32, #tpu.memory_space<vmem>>, %arg1: memref<8x8xf32, #tpu.memory_space<vmem>>, %arg2: memref<32x32xf32, #tpu.memory_space<vmem>>, %arg3: memref<8x32xf32, #tpu.memory_space<vmem>>, %arg4: memref<8x32xf32, #tpu.memory_space<vmem>>, %arg5: memref<2x32xf32, #tpu.memory_space<vmem>>, %arg6: memref<2x32xf32, #tpu.memory_space<vmem>>) attributes {dimension_semantics = [], scalar_prefetch = 0 : i64, scratch_operands = 0 : i64, tpu.core_type = #tpu.core_type<tc>} {
    %c0 = arith.constant 0 : index
    %c0_0 = arith.constant 0 : index
    %0 = vector.load %arg1[%c0, %c0_0] : memref<8x8xf32, #tpu.memory_space<vmem>>, vector<8x8xf32>
    %1 = math.tanh %0 : vector<8x8xf32>
    %c0_1 = arith.constant 0 : index
    %c0_2 = arith.constant 0 : index
    %2 = vector.load %arg0[%c0_1, %c0_2] : memref<2x32xf32, #tpu.memory_space<vmem>>, vector<2x32xf32>
    %c0_3 = arith.constant 0 : index
    %c0_4 = arith.constant 0 : index
    %3 = vector.load %arg2[%c0_3, %c0_4] : memref<32x32xf32, #tpu.memory_space<vmem>>, vector<32x32xf32>
    %cst = arith.constant dense<0.000000e+00> : vector<2x32xf32>
    %4 = tpu.matmul %2, %3, %cst {dimension_numbers = #tpu.dot_dimension_numbers<[1], [0], [0], [1], [0, 0, 1, 1], [], []>} : vector<2x32xf32>, vector<32x32xf32>, vector<2x32xf32> -> vector<2x32xf32>
    %c0_5 = arith.constant 0 : index
    %c0_6 = arith.constant 0 : index
    %5 = vector.load %arg3[%c0_5, %c0_6] : memref<8x32xf32, #tpu.memory_space<vmem>>, vector<8x32xf32>
    %cst_7 = arith.constant dense<0.000000e+00> : vector<8x32xf32>
    %6 = tpu.matmul %1, %5, %cst_7 {dimension_numbers = #tpu.dot_dimension_numbers<[1], [0], [0], [1], [0, 0, 1, 1], [], []>} : vector<8x8xf32>, vector<8x32xf32>, vector<8x32xf32> -> vector<8x32xf32>
    %c0_8 = arith.constant 0 : index
    %c0_9 = arith.constant 0 : index
    %7 = vector.load %arg4[%c0_8, %c0_9] : memref<8x32xf32, #tpu.memory_space<vmem>>, vector<8x32xf32>
    %cst_10 = arith.constant dense<0.000000e+00> : vector<8x32xf32>
    %8 = tpu.matmul %1, %7, %cst_10 {dimension_numbers = #tpu.dot_dimension_numbers<[1], [0], [0], [1], [0, 0, 1, 1], [], []>} : vector<8x8xf32>, vector<8x32xf32>, vector<8x32xf32> -> vector<8x32xf32>
    %9 = vector.extract_strided_slice %4 {offsets = [0, 0], sizes = [2, 8], strides = [1, 1]} : vector<2x32xf32> to vector<2x8xf32>
    %10 = vector.extract_strided_slice %6 {offsets = [0, 0], sizes = [8, 8], strides = [1, 1]} : vector<8x32xf32> to vector<8x8xf32>
    %11 = vector.extract_strided_slice %8 {offsets = [0, 0], sizes = [8, 8], strides = [1, 1]} : vector<8x32xf32> to vector<8x8xf32>
    %cst_11 = arith.constant dense<0.000000e+00> : vector<2x8xf32>
    %12 = tpu.matmul %9, %10, %cst_11 {dimension_numbers = #tpu.dot_dimension_numbers<[1], [1], [0], [0], [0, 0, 1, 0], [], []>} : vector<2x8xf32>, vector<8x8xf32>, vector<2x8xf32> -> vector<2x8xf32>
    %cst_12 = arith.constant 0.353553385 : f32
    %13 = vector.broadcast %cst_12 : f32 to vector<2x8xf32>
    %14 = arith.mulf %12, %13 : vector<2x8xf32>
    %cst_13 = arith.constant dense<0xFF800000> : vector<2xf32>
    %15 = vector.multi_reduction <maximumf>, %14, %cst_13 [1] : vector<2x8xf32> to vector<2xf32>
    %16 = vector.shape_cast %15 : vector<2xf32> to vector<2x1xf32>
    %17 = vector.broadcast %16 : vector<2x1xf32> to vector<2x8xf32>
    %18 = arith.subf %14, %17 : vector<2x8xf32>
    %19 = math.exp %18 : vector<2x8xf32>
    %cst_14 = arith.constant dense<0.000000e+00> : vector<2xf32>
    %20 = vector.multi_reduction <add>, %19, %cst_14 [1] : vector<2x8xf32> to vector<2xf32>
    %21 = vector.shape_cast %20 : vector<2xf32> to vector<2x1xf32>
    %22 = vector.broadcast %21 : vector<2x1xf32> to vector<2x8xf32>
    %23 = arith.divf %19, %22 : vector<2x8xf32>
    %cst_15 = arith.constant dense<0.000000e+00> : vector<2x8xf32>
    %24 = tpu.matmul %23, %11, %cst_15 {dimension_numbers = #tpu.dot_dimension_numbers<[1], [0], [0], [1], [0, 0, 1, 1], [], []>} : vector<2x8xf32>, vector<8x8xf32>, vector<2x8xf32> -> vector<2x8xf32>
    %25 = vector.extract_strided_slice %4 {offsets = [0, 8], sizes = [2, 8], strides = [1, 1]} : vector<2x32xf32> to vector<2x8xf32>
    %26 = vector.extract_strided_slice %6 {offsets = [0, 8], sizes = [8, 8], strides = [1, 1]} : vector<8x32xf32> to vector<8x8xf32>
    %27 = vector.extract_strided_slice %8 {offsets = [0, 8], sizes = [8, 8], strides = [1, 1]} : vector<8x32xf32> to vector<8x8xf32>
    %cst_16 = arith.constant dense<0.000000e+00> : vector<2x8xf32>
    %28 = tpu.matmul %25, %26, %cst_16 {dimension_numbers = #tpu.dot_dimension_numbers<[1], [1], [0], [0], [0, 0, 1, 0], [], []>} : vector<2x8xf32>, vector<8x8xf32>, vector<2x8xf32> -> vector<2x8xf32>
    %cst_17 = arith.constant 0.353553385 : f32
    %29 = vector.broadcast %cst_17 : f32 to vector<2x8xf32>
    %30 = arith.mulf %28, %29 : vector<2x8xf32>
    %cst_18 = arith.constant dense<0xFF800000> : vector<2xf32>
    %31 = vector.multi_reduction <maximumf>, %30, %cst_18 [1] : vector<2x8xf32> to vector<2xf32>
    %32 = vector.shape_cast %31 : vector<2xf32> to vector<2x1xf32>
    %33 = vector.broadcast %32 : vector<2x1xf32> to vector<2x8xf32>
    %34 = arith.subf %30, %33 : vector<2x8xf32>
    %35 = math.exp %34 : vector<2x8xf32>
    %cst_19 = arith.constant dense<0.000000e+00> : vector<2xf32>
    %36 = vector.multi_reduction <add>, %35, %cst_19 [1] : vector<2x8xf32> to vector<2xf32>
    %37 = vector.shape_cast %36 : vector<2xf32> to vector<2x1xf32>
    %38 = vector.broadcast %37 : vector<2x1xf32> to vector<2x8xf32>
    %39 = arith.divf %35, %38 : vector<2x8xf32>
    %cst_20 = arith.constant dense<0.000000e+00> : vector<2x8xf32>
    %40 = tpu.matmul %39, %27, %cst_20 {dimension_numbers = #tpu.dot_dimension_numbers<[1], [0], [0], [1], [0, 0, 1, 1], [], []>} : vector<2x8xf32>, vector<8x8xf32>, vector<2x8xf32> -> vector<2x8xf32>
    %41 = vector.extract_strided_slice %4 {offsets = [0, 16], sizes = [2, 8], strides = [1, 1]} : vector<2x32xf32> to vector<2x8xf32>
    %42 = vector.extract_strided_slice %6 {offsets = [0, 16], sizes = [8, 8], strides = [1, 1]} : vector<8x32xf32> to vector<8x8xf32>
    %43 = vector.extract_strided_slice %8 {offsets = [0, 16], sizes = [8, 8], strides = [1, 1]} : vector<8x32xf32> to vector<8x8xf32>
    %cst_21 = arith.constant dense<0.000000e+00> : vector<2x8xf32>
    %44 = tpu.matmul %41, %42, %cst_21 {dimension_numbers = #tpu.dot_dimension_numbers<[1], [1], [0], [0], [0, 0, 1, 0], [], []>} : vector<2x8xf32>, vector<8x8xf32>, vector<2x8xf32> -> vector<2x8xf32>
    %cst_22 = arith.constant 0.353553385 : f32
    %45 = vector.broadcast %cst_22 : f32 to vector<2x8xf32>
    %46 = arith.mulf %44, %45 : vector<2x8xf32>
    %cst_23 = arith.constant dense<0xFF800000> : vector<2xf32>
    %47 = vector.multi_reduction <maximumf>, %46, %cst_23 [1] : vector<2x8xf32> to vector<2xf32>
    %48 = vector.shape_cast %47 : vector<2xf32> to vector<2x1xf32>
    %49 = vector.broadcast %48 : vector<2x1xf32> to vector<2x8xf32>
    %50 = arith.subf %46, %49 : vector<2x8xf32>
    %51 = math.exp %50 : vector<2x8xf32>
    %cst_24 = arith.constant dense<0.000000e+00> : vector<2xf32>
    %52 = vector.multi_reduction <add>, %51, %cst_24 [1] : vector<2x8xf32> to vector<2xf32>
    %53 = vector.shape_cast %52 : vector<2xf32> to vector<2x1xf32>
    %54 = vector.broadcast %53 : vector<2x1xf32> to vector<2x8xf32>
    %55 = arith.divf %51, %54 : vector<2x8xf32>
    %cst_25 = arith.constant dense<0.000000e+00> : vector<2x8xf32>
    %56 = tpu.matmul %55, %43, %cst_25 {dimension_numbers = #tpu.dot_dimension_numbers<[1], [0], [0], [1], [0, 0, 1, 1], [], []>} : vector<2x8xf32>, vector<8x8xf32>, vector<2x8xf32> -> vector<2x8xf32>
    %57 = vector.extract_strided_slice %4 {offsets = [0, 24], sizes = [2, 8], strides = [1, 1]} : vector<2x32xf32> to vector<2x8xf32>
    %58 = vector.extract_strided_slice %6 {offsets = [0, 24], sizes = [8, 8], strides = [1, 1]} : vector<8x32xf32> to vector<8x8xf32>
    %59 = vector.extract_strided_slice %8 {offsets = [0, 24], sizes = [8, 8], strides = [1, 1]} : vector<8x32xf32> to vector<8x8xf32>
    %cst_26 = arith.constant dense<0.000000e+00> : vector<2x8xf32>
    %60 = tpu.matmul %57, %58, %cst_26 {dimension_numbers = #tpu.dot_dimension_numbers<[1], [1], [0], [0], [0, 0, 1, 0], [], []>} : vector<2x8xf32>, vector<8x8xf32>, vector<2x8xf32> -> vector<2x8xf32>
    %cst_27 = arith.constant 0.353553385 : f32
    %61 = vector.broadcast %cst_27 : f32 to vector<2x8xf32>
    %62 = arith.mulf %60, %61 : vector<2x8xf32>
    %cst_28 = arith.constant dense<0xFF800000> : vector<2xf32>
    %63 = vector.multi_reduction <maximumf>, %62, %cst_28 [1] : vector<2x8xf32> to vector<2xf32>
    %64 = vector.shape_cast %63 : vector<2xf32> to vector<2x1xf32>
    %65 = vector.broadcast %64 : vector<2x1xf32> to vector<2x8xf32>
    %66 = arith.subf %62, %65 : vector<2x8xf32>
    %67 = math.exp %66 : vector<2x8xf32>
    %cst_29 = arith.constant dense<0.000000e+00> : vector<2xf32>
    %68 = vector.multi_reduction <add>, %67, %cst_29 [1] : vector<2x8xf32> to vector<2xf32>
    %69 = vector.shape_cast %68 : vector<2xf32> to vector<2x1xf32>
    %70 = vector.broadcast %69 : vector<2x1xf32> to vector<2x8xf32>
    %71 = arith.divf %67, %70 : vector<2x8xf32>
    %cst_30 = arith.constant dense<0.000000e+00> : vector<2x8xf32>
    %72 = tpu.matmul %71, %59, %cst_30 {dimension_numbers = #tpu.dot_dimension_numbers<[1], [0], [0], [1], [0, 0, 1, 1], [], []>} : vector<2x8xf32>, vector<8x8xf32>, vector<2x8xf32> -> vector<2x8xf32>
    %73 = tpu.concatenate %24, %40, %56, %72 in 1 : vector<2x8xf32>, vector<2x8xf32>, vector<2x8xf32>, vector<2x8xf32> -> vector<2x32xf32>
    %c0_31 = arith.constant 0 : index
    %c0_32 = arith.constant 0 : index
    %74 = vector.load %arg5[%c0_31, %c0_32] : memref<2x32xf32, #tpu.memory_space<vmem>>, vector<2x32xf32>
    tpu.vector_store %arg5[%c0_31, %c0_32], %73 {strides = array<i32>} : memref<2x32xf32, #tpu.memory_space<vmem>>, vector<2x32xf32>,
    %75 = tpu.concatenate %23, %39, %55, %71 in 1 : vector<2x8xf32>, vector<2x8xf32>, vector<2x8xf32>, vector<2x8xf32> -> vector<2x32xf32>
    %c0_33 = arith.constant 0 : index
    %c0_34 = arith.constant 0 : index
    %76 = vector.load %arg6[%c0_33, %c0_34] : memref<2x32xf32, #tpu.memory_space<vmem>>, vector<2x32xf32>
    tpu.vector_store %arg6[%c0_33, %c0_34], %75 {strides = array<i32>} : memref<2x32xf32, #tpu.memory_space<vmem>>, vector<2x32xf32>,
    return
  }
}

module attributes {stable_mosaic.version = 11 : i64} {
  func.func @_matmul_kernel(%arg0: i32, %arg1: i32, %arg2: i32, %arg3: memref<8x32xf32, #tpu.memory_space<vmem>>, %arg4: memref<32x128xf32, #tpu.memory_space<vmem>>, %arg5: memref<1x128xf32, #tpu.memory_space<vmem>>, %arg6: memref<8x128xf32, #tpu.memory_space<vmem>>, %arg7: memref<8x128xf32, #tpu.memory_space<vmem>>) attributes {dimension_semantics = [#tpu.dimension_semantics<parallel>, #tpu.dimension_semantics<parallel>, #tpu.dimension_semantics<arbitrary>], iteration_bounds = array<i64: 1, 1, 1>, scalar_prefetch = 0 : i64, scratch_operands = 1 : i64, tpu.core_type = #tpu.core_type<tc>, window_params = [{transform_indices = @transform_0, window_bounds = array<i64: 8, 32>}, {transform_indices = @transform_1, window_bounds = array<i64: 32, 128>}, {transform_indices = @transform_2, window_bounds = array<i64: 1, 128>}, {transform_indices = @transform_3, window_bounds = array<i64: 8, 128>}]} {
    %c0_i32 = arith.constant 0 : i32
    %0 = arith.cmpi eq, %arg2, %c0_i32 : i32
    %1 = arith.extui %0 : i1 to i32
    %c0_i32_0 = arith.constant 0 : i32
    %2 = arith.cmpi ne, %1, %c0_i32_0 : i32
    scf.if %2 {
      %cst_10 = arith.constant 0.000000e+00 : f32
      %12 = vector.broadcast %cst_10 : f32 to vector<8x128xf32>
      %c0_11 = arith.constant 0 : index
      %c0_12 = arith.constant 0 : index
      %13 = vector.load %arg7[%c0_11, %c0_12] : memref<8x128xf32, #tpu.memory_space<vmem>>, vector<8x128xf32>
      tpu.vector_store %arg7[%c0_11, %c0_12], %12 {strides = array<i32>} : memref<8x128xf32, #tpu.memory_space<vmem>>, vector<8x128xf32>,
    } else {
    }
    %c0 = arith.constant 0 : index
    %c0_1 = arith.constant 0 : index
    %3 = vector.load %arg7[%c0, %c0_1] : memref<8x128xf32, #tpu.memory_space<vmem>>, vector<8x128xf32>
    %c0_2 = arith.constant 0 : index
    %c0_3 = arith.constant 0 : index
    %4 = vector.load %arg3[%c0_2, %c0_3] : memref<8x32xf32, #tpu.memory_space<vmem>>, vector<8x32xf32>
    %c0_4 = arith.constant 0 : index
    %c0_5 = arith.constant 0 : index
    %5 = vector.load %arg4[%c0_4, %c0_5] : memref<32x128xf32, #tpu.memory_space<vmem>>, vector<32x128xf32>
    %cst = arith.constant dense<0.000000e+00> : vector<8x128xf32>
    %6 = tpu.matmul %4, %5, %cst {dimension_numbers = #tpu.dot_dimension_numbers<[1], [0], [0], [1], [0, 0, 1, 1], [], []>} : vector<8x32xf32>, vector<32x128xf32>, vector<8x128xf32> -> vector<8x128xf32>
    %7 = arith.addf %3, %6 : vector<8x128xf32>
    %c0_6 = arith.constant 0 : index
    %c0_7 = arith.constant 0 : index
    %8 = vector.load %arg7[%c0_6, %c0_7] : memref<8x128xf32, #tpu.memory_space<vmem>>, vector<8x128xf32>
    tpu.vector_store %arg7[%c0_6, %c0_7], %7 {strides = array<i32>} : memref<8x128xf32, #tpu.memory_space<vmem>>, vector<8x128xf32>,
    %c0_i32_8 = arith.constant 0 : i32
    %9 = arith.cmpi eq, %arg2, %c0_i32_8 : i32
    %10 = arith.extui %9 : i1 to i32
    %c0_i32_9 = arith.constant 0 : i32
    %11 = arith.cmpi ne, %10, %c0_i32_9 : i32
    scf.if %11 {
      %c0_10 = arith.constant 0 : index
      %c0_11 = arith.constant 0 : index
      %12 = vector.load %arg7[%c0_10, %c0_11] : memref<8x128xf32, #tpu.memory_space<vmem>>, vector<8x128xf32>
      %c0_12 = arith.constant 0 : index
      %c0_13 = arith.constant 0 : index
      %13 = vector.load %arg5[%c0_12, %c0_13] : memref<1x128xf32, #tpu.memory_space<vmem>>, vector<1x128xf32>
      %14 = vector.broadcast %13 : vector<1x128xf32> to vector<8x128xf32>
      %15 = arith.addf %12, %14 : vector<8x128xf32>
      %c0_14 = arith.constant 0 : index
      %c0_15 = arith.constant 0 : index
      %16 = vector.load %arg6[%c0_14, %c0_15] : memref<8x128xf32, #tpu.memory_space<vmem>>, vector<8x128xf32>
      tpu.vector_store %arg6[%c0_14, %c0_15], %15 {strides = array<i32>} : memref<8x128xf32, #tpu.memory_space<vmem>>, vector<8x128xf32>,
    } else {
    }
    return
  }
  func.func @transform_0(%arg0: i32, %arg1: i32, %arg2: i32) -> (i32, i32) {
    %c0_i32 = arith.constant 0 : i32
    return %arg0, %arg2 : i32, i32
  }
  func.func @transform_1(%arg0: i32, %arg1: i32, %arg2: i32) -> (i32, i32) {
    %c0_i32 = arith.constant 0 : i32
    return %arg2, %arg1 : i32, i32
  }
  func.func @transform_2(%arg0: i32, %arg1: i32, %arg2: i32) -> (i32, i32) {
    %c0_i32 = arith.constant 0 : i32
    %c0_i32_0 = arith.constant 0 : i32
    return %c0_i32, %arg1 : i32, i32
  }
  func.func @transform_3(%arg0: i32, %arg1: i32, %arg2: i32) -> (i32, i32) {
    %c0_i32 = arith.constant 0 : i32
    return %arg0, %arg1 : i32, i32
  }
}

module attributes {stable_mosaic.version = 11 : i64} {
  func.func @_gru_kernel(%arg0: i32, %arg1: memref<2x2x96xf32, #tpu.memory_space<vmem>>, %arg2: memref<32x96xf32, #tpu.memory_space<vmem>>, %arg3: memref<1x96xf32, #tpu.memory_space<vmem>>, %arg4: memref<2x32xf32, #tpu.memory_space<vmem>>) attributes {dimension_semantics = [#tpu.dimension_semantics<arbitrary>], iteration_bounds = array<i64: 1>, scalar_prefetch = 0 : i64, scratch_operands = 0 : i64, tpu.core_type = #tpu.core_type<tc>, window_params = [{transform_indices = @transform_0, window_bounds = array<i64: 2, 2, 96>}, {pipeline_mode = #tpu.pipeline_mode<synchronous>, transform_indices = @transform_1, window_bounds = array<i64: 32, 96>}, {pipeline_mode = #tpu.pipeline_mode<synchronous>, transform_indices = @transform_2, window_bounds = array<i64: 1, 96>}, {pipeline_mode = #tpu.pipeline_mode<synchronous>, transform_indices = @transform_3, window_bounds = array<i64: 2, 32>}]} {
    %c0_i32 = arith.constant 0 : i32
    %0 = arith.cmpi eq, %arg0, %c0_i32 : i32
    %1 = arith.extui %0 : i1 to i32
    %c0_i32_0 = arith.constant 0 : i32
    %2 = arith.cmpi ne, %1, %c0_i32_0 : i32
    scf.if %2 {
      %cst_28 = arith.constant 0.000000e+00 : f32
      %79 = vector.broadcast %cst_28 : f32 to vector<2x32xf32>
      %c0_29 = arith.constant 0 : index
      %c0_30 = arith.constant 0 : index
      %80 = vector.load %arg4[%c0_29, %c0_30] : memref<2x32xf32, #tpu.memory_space<vmem>>, vector<2x32xf32>
      tpu.vector_store %arg4[%c0_29, %c0_30], %79 {strides = array<i32>} : memref<2x32xf32, #tpu.memory_space<vmem>>, vector<2x32xf32>,
    } else {
    }
    %c0 = arith.constant 0 : index
    %c0_1 = arith.constant 0 : index
    %3 = vector.load %arg2[%c0, %c0_1] : memref<32x96xf32, #tpu.memory_space<vmem>>, vector<32x96xf32>
    %c0_2 = arith.constant 0 : index
    %c0_3 = arith.constant 0 : index
    %4 = vector.load %arg3[%c0_2, %c0_3] : memref<1x96xf32, #tpu.memory_space<vmem>>, vector<1x96xf32>
    %c0_4 = arith.constant 0 : index
    %c0_5 = arith.constant 0 : index
    %5 = vector.load %arg4[%c0_4, %c0_5] : memref<2x32xf32, #tpu.memory_space<vmem>>, vector<2x32xf32>
    %c0_i32_6 = arith.constant 0 : i32
    %cst = arith.constant dense<0.000000e+00> : vector<2x96xf32>
    %6 = tpu.matmul %5, %3, %cst {dimension_numbers = #tpu.dot_dimension_numbers<[1], [0], [0], [1], [0, 0, 1, 1], [], []>} : vector<2x32xf32>, vector<32x96xf32>, vector<2x96xf32> -> vector<2x96xf32>
    %7 = vector.broadcast %4 : vector<1x96xf32> to vector<2x96xf32>
    %8 = arith.addf %6, %7 : vector<2x96xf32>
    %9 = arith.index_cast %c0_i32_6 : i32 to index
    %c0_7 = arith.constant 0 : index
    %c0_8 = arith.constant 0 : index
    %10 = vector.load %arg1[%9, %c0_7, %c0_8] : memref<2x2x96xf32, #tpu.memory_space<vmem>>, vector<1x2x96xf32>
    %11 = vector.shape_cast %10 : vector<1x2x96xf32> to vector<2x96xf32>
    %12 = vector.extract_strided_slice %11 {offsets = [0, 0], sizes = [2, 32], strides = [1, 1]} : vector<2x96xf32> to vector<2x32xf32>
    %13 = vector.extract_strided_slice %8 {offsets = [0, 0], sizes = [2, 32], strides = [1, 1]} : vector<2x96xf32> to vector<2x32xf32>
    %14 = arith.addf %12, %13 : vector<2x32xf32>
    %cst_9 = arith.constant 0.000000e+00 : f32
    %15 = vector.broadcast %cst_9 : f32 to vector<2x32xf32>
    %16 = arith.subf %15, %14 : vector<2x32xf32>
    %17 = math.exp %16 : vector<2x32xf32>
    %cst_10 = arith.constant 1.000000e+00 : f32
    %18 = vector.broadcast %cst_10 : f32 to vector<2x32xf32>
    %19 = arith.addf %18, %17 : vector<2x32xf32>
    %cst_11 = arith.constant 1.000000e+00 : f32
    %20 = vector.broadcast %cst_11 : f32 to vector<2x32xf32>
    %21 = arith.divf %20, %19 : vector<2x32xf32>
    %22 = vector.extract_strided_slice %11 {offsets = [0, 32], sizes = [2, 32], strides = [1, 1]} : vector<2x96xf32> to vector<2x32xf32>
    %23 = vector.extract_strided_slice %8 {offsets = [0, 32], sizes = [2, 32], strides = [1, 1]} : vector<2x96xf32> to vector<2x32xf32>
    %24 = arith.addf %22, %23 : vector<2x32xf32>
    %cst_12 = arith.constant 0.000000e+00 : f32
    %25 = vector.broadcast %cst_12 : f32 to vector<2x32xf32>
    %26 = arith.subf %25, %24 : vector<2x32xf32>
    %27 = math.exp %26 : vector<2x32xf32>
    %cst_13 = arith.constant 1.000000e+00 : f32
    %28 = vector.broadcast %cst_13 : f32 to vector<2x32xf32>
    %29 = arith.addf %28, %27 : vector<2x32xf32>
    %cst_14 = arith.constant 1.000000e+00 : f32
    %30 = vector.broadcast %cst_14 : f32 to vector<2x32xf32>
    %31 = arith.divf %30, %29 : vector<2x32xf32>
    %32 = vector.extract_strided_slice %11 {offsets = [0, 64], sizes = [2, 32], strides = [1, 1]} : vector<2x96xf32> to vector<2x32xf32>
    %33 = vector.extract_strided_slice %8 {offsets = [0, 64], sizes = [2, 32], strides = [1, 1]} : vector<2x96xf32> to vector<2x32xf32>
    %34 = arith.mulf %21, %33 : vector<2x32xf32>
    %35 = arith.addf %32, %34 : vector<2x32xf32>
    %36 = math.tanh %35 : vector<2x32xf32>
    %cst_15 = arith.constant 1.000000e+00 : f32
    %37 = vector.broadcast %cst_15 : f32 to vector<2x32xf32>
    %38 = arith.subf %37, %31 : vector<2x32xf32>
    %39 = arith.mulf %38, %36 : vector<2x32xf32>
    %40 = arith.mulf %31, %5 : vector<2x32xf32>
    %41 = arith.addf %39, %40 : vector<2x32xf32>
    %c1_i32 = arith.constant 1 : i32
    %cst_16 = arith.constant dense<0.000000e+00> : vector<2x96xf32>
    %42 = tpu.matmul %41, %3, %cst_16 {dimension_numbers = #tpu.dot_dimension_numbers<[1], [0], [0], [1], [0, 0, 1, 1], [], []>} : vector<2x32xf32>, vector<32x96xf32>, vector<2x96xf32> -> vector<2x96xf32>
    %43 = vector.broadcast %4 : vector<1x96xf32> to vector<2x96xf32>
    %44 = arith.addf %42, %43 : vector<2x96xf32>
    %45 = arith.index_cast %c1_i32 : i32 to index
    %c0_17 = arith.constant 0 : index
    %c0_18 = arith.constant 0 : index
    %46 = vector.load %arg1[%45, %c0_17, %c0_18] : memref<2x2x96xf32, #tpu.memory_space<vmem>>, vector<1x2x96xf32>
    %47 = vector.shape_cast %46 : vector<1x2x96xf32> to vector<2x96xf32>
    %48 = vector.extract_strided_slice %47 {offsets = [0, 0], sizes = [2, 32], strides = [1, 1]} : vector<2x96xf32> to vector<2x32xf32>
    %49 = vector.extract_strided_slice %44 {offsets = [0, 0], sizes = [2, 32], strides = [1, 1]} : vector<2x96xf32> to vector<2x32xf32>
    %50 = arith.addf %48, %49 : vector<2x32xf32>
    %cst_19 = arith.constant 0.000000e+00 : f32
    %51 = vector.broadcast %cst_19 : f32 to vector<2x32xf32>
    %52 = arith.subf %51, %50 : vector<2x32xf32>
    %53 = math.exp %52 : vector<2x32xf32>
    %cst_20 = arith.constant 1.000000e+00 : f32
    %54 = vector.broadcast %cst_20 : f32 to vector<2x32xf32>
    %55 = arith.addf %54, %53 : vector<2x32xf32>
    %cst_21 = arith.constant 1.000000e+00 : f32
    %56 = vector.broadcast %cst_21 : f32 to vector<2x32xf32>
    %57 = arith.divf %56, %55 : vector<2x32xf32>
    %58 = vector.extract_strided_slice %47 {offsets = [0, 32], sizes = [2, 32], strides = [1, 1]} : vector<2x96xf32> to vector<2x32xf32>
    %59 = vector.extract_strided_slice %44 {offsets = [0, 32], sizes = [2, 32], strides = [1, 1]} : vector<2x96xf32> to vector<2x32xf32>
    %60 = arith.addf %58, %59 : vector<2x32xf32>
    %cst_22 = arith.constant 0.000000e+00 : f32
    %61 = vector.broadcast %cst_22 : f32 to vector<2x32xf32>
    %62 = arith.subf %61, %60 : vector<2x32xf32>
    %63 = math.exp %62 : vector<2x32xf32>
    %cst_23 = arith.constant 1.000000e+00 : f32
    %64 = vector.broadcast %cst_23 : f32 to vector<2x32xf32>
    %65 = arith.addf %64, %63 : vector<2x32xf32>
    %cst_24 = arith.constant 1.000000e+00 : f32
    %66 = vector.broadcast %cst_24 : f32 to vector<2x32xf32>
    %67 = arith.divf %66, %65 : vector<2x32xf32>
    %68 = vector.extract_strided_slice %47 {offsets = [0, 64], sizes = [2, 32], strides = [1, 1]} : vector<2x96xf32> to vector<2x32xf32>
    %69 = vector.extract_strided_slice %44 {offsets = [0, 64], sizes = [2, 32], strides = [1, 1]} : vector<2x96xf32> to vector<2x32xf32>
    %70 = arith.mulf %57, %69 : vector<2x32xf32>
    %71 = arith.addf %68, %70 : vector<2x32xf32>
    %72 = math.tanh %71 : vector<2x32xf32>
    %cst_25 = arith.constant 1.000000e+00 : f32
    %73 = vector.broadcast %cst_25 : f32 to vector<2x32xf32>
    %74 = arith.subf %73, %67 : vector<2x32xf32>
    %75 = arith.mulf %74, %72 : vector<2x32xf32>
    %76 = arith.mulf %67, %41 : vector<2x32xf32>
    %77 = arith.addf %75, %76 : vector<2x32xf32>
    %c2_i32 = arith.constant 2 : i32
    %c0_26 = arith.constant 0 : index
    %c0_27 = arith.constant 0 : index
    %78 = vector.load %arg4[%c0_26, %c0_27] : memref<2x32xf32, #tpu.memory_space<vmem>>, vector<2x32xf32>
    tpu.vector_store %arg4[%c0_26, %c0_27], %77 {strides = array<i32>} : memref<2x32xf32, #tpu.memory_space<vmem>>, vector<2x32xf32>,
    return
  }
  func.func @transform_0(%arg0: i32) -> (i32, i32, i32) {
    %c0_i32 = arith.constant 0 : i32
    %c0_i32_0 = arith.constant 0 : i32
    %c0_i32_1 = arith.constant 0 : i32
    return %arg0, %c0_i32, %c0_i32_0 : i32, i32, i32
  }
  func.func @transform_1(%arg0: i32) -> (i32, i32) {
    %c0_i32 = arith.constant 0 : i32
    %c0_i32_0 = arith.constant 0 : i32
    %c0_i32_1 = arith.constant 0 : i32
    return %c0_i32, %c0_i32_0 : i32, i32
  }
  func.func @transform_2(%arg0: i32) -> (i32, i32) {
    %c0_i32 = arith.constant 0 : i32
    %c0_i32_0 = arith.constant 0 : i32
    %c0_i32_1 = arith.constant 0 : i32
    return %c0_i32, %c0_i32_0 : i32, i32
  }
  func.func @transform_3(%arg0: i32) -> (i32, i32) {
    %c0_i32 = arith.constant 0 : i32
    %c0_i32_0 = arith.constant 0 : i32
    %c0_i32_1 = arith.constant 0 : i32
    return %c0_i32, %c0_i32_0 : i32, i32
  }
}

</mosaic_0001>

<bundles_post_ra>
// kernel: _lambda_.5
= control target key start
LH: loop header
LB: loop body
LE: loop exit
PB: predicated region body
PF: predicated region fallthrough
CT: control target
= control target key end

     0   :  { %vm72_vm0 = vcmask 1040384   ;;  %vm47_vm1 = vcmask 72704   ;;  %vm304_vm2 = vmmov 1   ;;  %s398_s1 = inlined_call_operand.vmem [shape: f32[9,128], index: 1, kind: input, shape index: {}]   ;;  %s399_s0 = inlined_call_operand.vmem [shape: f32[64,9], index: 0, kind: input, shape index: {}]   ;;  %s400_s2 = inlined_call_operand.vmem [shape: f32[1,128], index: 2, kind: input, shape index: {}]   ;;  %s401_s3 = inlined_call_operand.vmem [shape: f32[1,128], index: 3, kind: input, shape index: {}]   ;;  %s402_s4 = inlined_call_operand.vmem [shape: f32[64,128], index: 4, kind: output, shape index: {}]  }
   0x1   :  { %v45_v0 = vld [vmem:[%s398_s1] sm:$0xff]  ;;  %v46_v1 = vld [vmem:[%s398_s1 + $0x8] sm:$0x1]  ;;  %vm296_vm3 = vmpackc.low %vm72_vm0, %vm304_vm2 }
   0x2   :  { %v295_v2 = vpack.c.bf16 %v46_v1, %v45_v0  ;;  %v37_v3 = vld [vmem:[%s399_s0] sm:$0xff]  ;;  %v38_v5 = vld [vmem:[%s399_s0 + $0x8] sm:$0xff]  ;;  %v39_v7 = vld [vmem:[%s399_s0 + $0x10] sm:$0xff] }
   0x3   :  { %v41_v4 = vld [vmem:[%s399_s0 + $0x20] sm:$0xff]  ;;  %283 = vmatprep.mubr.msk.f32.mxu0 %vm47_vm1, %v37_v3  ;;  %v42_v6 = vld [vmem:[%s399_s0 + $0x28] sm:$0xff]  ;;  %v43_v8 = vld [vmem:[%s399_s0 + $0x30] sm:$0xff] }
   0x4   :  { %289 = vmatprep.mubr.msk.f32.mxu1 %vm47_vm1, %v41_v4  ;;  %297 = vmatprep.subr.msk.bf16.mxu0 %vm296_vm3, %v295_v2  ;;  %v40_v9 = vld [vmem:[%s399_s0 + $0x18] sm:$0xff]  ;;  %v267_v11 = vld [vmem:[%s400_s2] ss:$0 sm:$0xff] }
   0x5   :  { %301 = vmatprep.subr.msk.bf16.mxu1 %vm296_vm3, %v295_v2  ;;  %300 = vmatpush3.bf16.msk.msra.mxu0 %vm296_vm3, %v295_v2  ;;  %v44_v10 = vld [vmem:[%s399_s0 + $0x38] sm:$0xff]  ;;  %v268_v13 = vld [vmem:[%s401_s3] ss:$0 sm:$0xff] }
   0x6   :  { %302 = vmatpush3.bf16.msk.msra.mxu1 %vm296_vm3, %v295_v2 }
   0x8   :  { %284 = vmatmul.mubr.msk.f32.vlgmr.msra.gmra.mrb[0].mxu0 %vm47_vm1, %v38_v5 }
   0x9   :  { %290 = vmatmul.mubr.msk.f32.vlgmr.msra.gmra.mrb[0].mxu1 %vm47_vm1, %v42_v6  ;;  %286 = vmatprep.mubr.msk.f32.mxu0 %vm47_vm1, %v39_v7 }
   0xa   :  { %292 = vmatprep.mubr.msk.f32.mxu1 %vm47_vm1, %v43_v8 }
   0xc   :  { %287 = vmatmul.mubr.msk.f32.gmra.mrb[2].mxu0 %vm47_vm1, %v40_v9 }
   0xd   :  { %293 = vmatmul.mubr.msk.f32.gmra.mrb[2].mxu1 %vm47_vm1, %v44_v10 }
  0xdb   :  { %v285_v12 = vpop.f32.mrb[0].mxu0 }
  0xdc   :  { %v291_v14 = vpop.f32.mrb[0].mxu1  ;;  %v216_v15 = vmul.f32 %v285_v12, %v267_v11  ;;  %v142_v17 = vpop.f32.mrb[1].mxu0 }
  0xdd   :  { %v220_v16 = vmul.f32 %v291_v14, %v267_v11  ;;  %v162_v18 = vpop.f32.mrb[1].mxu1  ;;  %v215_v19 = vmul.f32 %v267_v11, %v142_v17 }
  0xde   :  { %v219_v20 = vmul.f32 %v267_v11, %v162_v18  ;;  %v231_v21 = vadd.f32 %v268_v13, %v216_v15 }
  0xdf   :  { %v235_v22 = vadd.f32 %v268_v13, %v220_v16  ;;  %v230_v23 = vadd.f32 %v268_v13, %v215_v19  ;;  %v288_v25 = vpop.f32.mrb[2].mxu0 }
  0xe0   :  { %v234_v24 = vadd.f32 %v268_v13, %v219_v20  ;;  %v294_v26 = vpop.f32.mrb[2].mxu1  ;;  %v239_v27 = vmax.f32 %v231_v21, 0.0  ;;  %v218_v29 = vmul.f32 %v288_v25, %v267_v11  ;;  %v152_v31 = vpop.f32.mrb[3].mxu0 }
  0xe1   :  { %v243_v28 = vmax.f32 %v235_v22, 0.0  ;;  %v222_v30 = vmul.f32 %v294_v26, %v267_v11  ;;  %v172_v32 = vpop.f32.mrb[3].mxu1  ;;  %v238_v33 = vmax.f32 %v230_v23, 0.0  ;;  %v217_v35 = vmul.f32 %v267_v11, %v152_v31 }
  0xe2   :  { %v242_v34 = vmax.f32 %v234_v24, 0.0  ;;  %v221_v36 = vmul.f32 %v267_v11, %v172_v32  ;;  %247 = vst [vmem:[%s402_s4 + $0x8] sm:$0xff] %v239_v27  ;;  %v233_v37 = vadd.f32 %v268_v13, %v218_v29 }
  0xe3   :  { %251 = vst [vmem:[%s402_s4 + $0x28] sm:$0xff] %v243_v28  ;;  %v237_v38 = vadd.f32 %v268_v13, %v222_v30  ;;  %246 = vst [vmem:[%s402_s4] sm:$0xff] %v238_v33  ;;  %v232_v39 = vadd.f32 %v268_v13, %v217_v35 }
  0xe4   :  { %250 = vst [vmem:[%s402_s4 + $0x20] sm:$0xff] %v242_v34  ;;  %v236_v40 = vadd.f32 %v268_v13, %v221_v36  ;;  %v241_v41 = vmax.f32 %v233_v37, 0.0 }
  0xe5   :  { %v245_v42 = vmax.f32 %v237_v38, 0.0  ;;  %v240_v43 = vmax.f32 %v232_v39, 0.0 }
  0xe6   :  { %v244_v44 = vmax.f32 %v236_v40, 0.0  ;;  %249 = vst [vmem:[%s402_s4 + $0x18] sm:$0xff] %v241_v41 }
  0xe7   :  { %253 = vst [vmem:[%s402_s4 + $0x38] sm:$0xff] %v245_v42  ;;  %248 = vst [vmem:[%s402_s4 + $0x10] sm:$0xff] %v240_v43 }
  0xe8   :  { %252 = vst [vmem:[%s402_s4 + $0x30] sm:$0xff] %v244_v44 }

// kernel: _lambda_.6
= control target key start
LH: loop header
LB: loop body
LE: loop exit
PB: predicated region body
PF: predicated region fallthrough
CT: control target
= control target key end

     0   :  { %vm32_vm0 = vcmask 293888   ;;  %vm39_vm1 = vcmask 1043456   ;;  %s246_s1 = inlined_call_operand.vmem [shape: f32[36,128], index: 1, kind: input, shape index: {}]   ;;  %s247_s0 = inlined_call_operand.vmem [shape: f32[16,36], index: 0, kind: input, shape index: {}]   ;;  %s248_s2 = inlined_call_operand.vmem [shape: f32[1,128], index: 2, kind: input, shape index: {}]   ;;  %s249_s3 = inlined_call_operand.vmem [shape: f32[1,128], index: 3, kind: input, shape index: {}]   ;;  %s250_s4 = inlined_call_operand.vmem [shape: f32[16,128], index: 4, kind: output, shape index: {}]  }
   0x1   :  { %v27_v0 = vld [vmem:[%s246_s1] sm:$0xff]  ;;  %v28_v1 = vld [vmem:[%s246_s1 + $0x8] sm:$0xff]  ;;  %v29_v2 = vld [vmem:[%s246_s1 + $0x10] sm:$0xff] }
   0x2   :  { %v178_v3 = vpack.c.bf16 %v28_v1, %v27_v0  ;;  %v30_v4 = vld [vmem:[%s246_s1 + $0x18] sm:$0xff]  ;;  %v25_v5 = vld [vmem:[%s247_s0] sm:$0xff]  ;;  %v26_v8 = vld [vmem:[%s247_s0 + $0x8] sm:$0xff] }
   0x3   :  { %v182_v6 = vpack.c.bf16 %v30_v4, %v29_v2  ;;  %175 = vmatprep.mubr.msk.f32.mxu0 %vm32_vm0, %v25_v5  ;;  %v31_v7 = vld [vmem:[%s246_s1 + $0x20] sm:$0xf] }
   0x4   :  { %179 = vmatprep.subr.bf16.mxu0 %v178_v3  ;;  %v156_v9 = vld [vmem:[%s248_s2] ss:$0 sm:$0xff] }
   0x5   :  { %181 = vmatpush3.bf16.msra.mxu0 %v178_v3  ;;  %v157_v11 = vld [vmem:[%s249_s3] ss:$0 sm:$0xff] }
   0x6   :  { %183 = vmatprep.subr.bf16.mxu0 %v182_v6 }
   0x9   :  { %185 = vmatpush3.bf16.msra.mxu0 %v182_v6 }
   0xa   :  { %173 = vmatprep.subr.msk.mxu0 %vm39_vm1, %v31_v7 }
   0xd   :  { %174 = vmatpush3.msk.msra.mxu0 %vm39_vm1, %v31_v7 }
   0xe   :  { %176 = vmatmul.mubr.msk.f32.vlgmr.msra.gmra.mrb[0].mxu0 %vm32_vm0, %v26_v8 }
  0xe1   :  { %v177_v10 = vpop.f32.mrb[0].mxu0 }
  0xe2   :  { %v135_v12 = vmul.f32 %v177_v10, %v156_v9  ;;  %v109_v13 = vpop.f32.mrb[1].mxu0 }
  0xe3   :  { %v134_v14 = vmul.f32 %v156_v9, %v109_v13 }
  0xe4   :  { %v144_v15 = vadd.f32 %v157_v11, %v135_v12 }
  0xe5   :  { %v143_v16 = vadd.f32 %v157_v11, %v134_v14 }
  0xe6   :  { %v146_v17 = vmax.f32 %v144_v15, 0.0 }
  0xe7   :  { %v145_v18 = vmax.f32 %v143_v16, 0.0 }
  0xe8   :  { %148 = vst [vmem:[%s250_s4 + $0x8] sm:$0xff] %v146_v17 }
  0xe9   :  { %147 = vst [vmem:[%s250_s4] sm:$0xff] %v145_v18 }

// kernel: _lambda_.7
= control target key start
LH: loop header
LB: loop body
LE: loop exit
PB: predicated region body
PF: predicated region fallthrough
CT: control target
= control target key end

     0   :  { %v145_v0 = vmov 0.0|0.0   ;;  %vm146_vm0 = vmmov 0   ;;  %v147_v4 = vmov 0.0   ;;  %vm25_vm1 = vcmask 261120   ;;  %s189_s1 = inlined_call_operand.vmem [shape: f32[32,128], index: 1, kind: input, shape index: {}]   ;;  %s190_s0 = inlined_call_operand.vmem [shape: f32[8,32], index: 0, kind: input, shape index: {}]   ;;  %s191_s2 = inlined_call_operand.vmem [shape: f32[1,128], index: 2, kind: input, shape index: {}]   ;;  %s192_s3 = inlined_call_operand.vmem [shape: f32[8,128], index: 3, kind: output, shape index: {}]  }
   0x1   :  { %136 = vmatprep.subr.bf16.mxu0 %v145_v0  ;;  %v21_v1 = vld [vmem:[%s189_s1] sm:$0xff]  ;;  %v22_v2 = vld [vmem:[%s189_s1 + $0x8] sm:$0xff]  ;;  %v23_v3 = vld [vmem:[%s189_s1 + $0x10] sm:$0xff]  ;;  %133 = vmatprep.mubr.msk.f32.mxu0 %vm146_vm0, %v147_v4 }
   0x2   :  { %v137_v5 = vpack.c.bf16 %v22_v2, %v21_v1  ;;  %v24_v6 = vld [vmem:[%s189_s1 + $0x18] sm:$0xff]  ;;  %v20_v8 = vld [vmem:[%s190_s0] sm:$0xff] }
   0x3   :  { %v140_v7 = vpack.c.bf16 %v24_v6, %v23_v3  ;;  %v119_v9 = vld [vmem:[%s191_s2] ss:$0 sm:$0xff] }
   0x4   :  { %138 = vmatpush3.bf16.msra.mxu0 %v137_v5 }
   0x5   :  { %139 = vmatprep.subr.bf16.mxu0 %v145_v0 }
   0x8   :  { %141 = vmatpush3.bf16.msra.mxu0 %v140_v7 }
   0xb   :  { %134 = vmatmul.mubr.msk.f32.vlgmr.msra.gmra.mrb[0].mxu0 %vm25_vm1, %v20_v8 }
  0xde   :  { %v95_v10 = vpop.f32.mrb[0].mxu0 }
  0xdf   :  { %v112_v11 = vadd.f32 %v119_v9, %v95_v10  ;;  %v135_v12 = vpop.f32.mrb[1].mxu0 }
  0xe1   :  { %113 = vst [vmem:[%s192_s3] sm:$0xff] %v112_v11 }

// kernel: _lambda_.8
= control target key start
LH: loop header
LB: loop body
LE: loop exit
PB: predicated region body
PF: predicated region fallthrough
CT: control target
= control target key end

     0   :  { %vm18_vm0 = vcmask 254976   ;;  %v315_v0 = vmov 0.0|0.0   ;;  %v316_v4 = vmov 0.0   ;;  %vm317_vm1 = vmmov 0   ;;  %s320_s28 = smov 32   ;;  %s383_s1 = inlined_call_operand.vmem [shape: f32[32,96], index: 1, kind: input, shape index: {}]   ;;  %s384_s3 = inlined_call_operand.vmem [shape: f32[2,32], index: 3, kind: output, shape index: {}]   ;;  %s385_s2 = inlined_call_operand.vmem [shape: f32[1,96], index: 2, kind: input, shape index: {}]   ;;  %s386_s0 = inlined_call_operand.vmem [shape: f32[2,2,96], index: 0, kind: input, shape index: {}]  }
   0x1   :  { %285 = vmatprep.subr.bf16.mxu0 %v315_v0  ;;  %v20_v1 = vld [vmem:[%s383_s1] sm:$0xff]  ;;  %v21_v2 = vld [vmem:[%s383_s1 + $0x8] sm:$0xff]  ;;  %v22_v3 = vld [vmem:[%s383_s1 + $0x10] sm:$0xff]  ;;  %19 = vst.msk [vmem:[%s384_s3] sm:$0x3] %vm18_vm0, %v316_v4  ;;  %271 = vmatprep.mubr.msk.f32.mxu0 %vm317_vm1, %v316_v4  ;;  %vm32_vm2 = vcmask 261120  }
   0x2   :  { %v286_v5 = vpack.c.bf16 %v21_v2, %v20_v1  ;;  %v23_v6 = vld [vmem:[%s383_s1 + $0x18] sm:$0xff]  ;;  %291 = vmatprep.subr.bf16.mxu1 %v315_v0  ;;  %282 = vmatprep.mubr.msk.f32.mxu1 %vm317_vm1, %v316_v4  ;;  %v249_v9 = vld [vmem:[%s385_s2] ss:$0 sm:$0xff]  ;;  %s318_s1 = smov 64   ;;  %s319_s2 = smov 96  }
   0x3   :  { %v289_v7 = vpack.c.bf16 %v23_v6, %v22_v3  ;;  %v106_v13 = vld [vmem:[%s386_s0] sm:$0x3]  ;;  %v252_v35 = vld [vmem:[%s386_s0 + $0x2] sm:$0x3] }
   0x4   :  { %287 = vmatpush3.bf16.msra.mxu0 %v286_v5  ;;  %293 = vmatpush3.bf16.msra.mxu1 %v286_v5 }
   0x5   :  { %288 = vmatprep.subr.bf16.mxu0 %v315_v0  ;;  %294 = vmatprep.subr.bf16.mxu1 %v315_v0 }
   0x8   :  { %290 = vmatpush3.bf16.msra.mxu0 %v289_v7  ;;  %v25_v8 = vld [vmem:[%s384_s3] sm:$0x3]  ;;  %296 = vmatpush3.bf16.msra.mxu1 %v289_v7 }
   0xb   :  { %272 = vmatmul.mubr.msk.f32.vlgmr.msra.gmra.mrb[0].mxu0 %vm32_vm2, %v25_v8 }
  0xde   :  { %v102_v10 = vpop.f32.mrb[0].mxu0 }
  0xdf   :  { %v103_v11 = vadd.f32 %v249_v9, %v102_v10  ;;  %v273_v12 = vpop.f32.mrb[1].mxu0 }
  0xe1   :  { %115 = vrot.lane.b32.xlu0 %v103_v11, %s318_s1  ;;  %v107_v14 = vadd.f32 %v106_v13, %v103_v11 }
  0xe3   :  { %v108_v15 = vsub.f32 0.0, %v107_v14 }
  0xe5   :  { %v109_v16 = vmul.f32 1.442695, %v108_v15 }
  0xe7   :  { %303 = vpow2.f32 %v109_v16 }
  0xf1   :  { %v304_v17 = vpop.eup %303 }
  0xf2   :  { %v111_v18 = vadd.f32 1.0, %v304_v17 }
  0xf4   :  { %305 = vrcp.f32 %v111_v18 }
  0xfe   :  { %v306_v19 = vpop.eup %305 }
  0xff   :  { %v125_v26 = vsub.f32 1.0, %v306_v19 }
 0x153   :  { %v116_v20 = vpop.permute.xlu0 %115 }
 0x154   :  { %v118_v21 = vmul.f32 %v306_v19, %v116_v20 }
 0x156   :  { %120 = vrot.lane.b32.xlu0 %v118_v21, %s318_s1 }
 0x1c8   :  { %v121_v22 = vpop.permute.xlu0 %120 }
 0x1c9   :  { %v123_v23 = vadd.f32 %v121_v22, %v106_v13 }
 0x1cb   :  { %307 = vtanh.f32 %v123_v23 }
 0x1d5   :  { %v308_v24 = vpop.eup %307 }
 0x1d6   :  { %127 = vrot.lane.b32.xlu1 %v308_v24, %s319_s2 }
 0x1da   :  { %131 = vrot.lane.b32.xlu1 %v25_v8, %s320_s28 }
 0x248   :  { %v128_v25 = vpop.permute.xlu1 %127 }
 0x249   :  { %v130_v28 = vmul.f32 %v128_v25, %v125_v26 }
 0x24c   :  { %v132_v27 = vpop.permute.xlu1 %131 }
 0x24d   :  { %v134_v29 = vmul.f32 %v306_v19, %v132_v27 }
 0x24f   :  { %v135_v30 = vadd.f32 %v134_v29, %v130_v28 }
 0x251   :  { %137 = vrot.lane.b32.xlu0 %v135_v30, %s319_s2 }
 0x2c3   :  { %v138_v31 = vpop.permute.xlu0 %137 }
 0x2c4   :  { %283 = vmatmul.mubr.msk.f32.vlgmr.msra.gmra.mrb[0].mxu1 %vm32_vm2, %v138_v31 }
 0x397   :  { %v207_v32 = vpop.f32.mrb[0].mxu1 }
 0x398   :  { %v208_v33 = vadd.f32 %v249_v9, %v207_v32  ;;  %v284_v34 = vpop.f32.mrb[1].mxu1 }
 0x39a   :  { %221 = vrot.lane.b32.xlu1 %v208_v33, %s318_s1  ;;  %v213_v36 = vadd.f32 %v252_v35, %v208_v33 }
 0x39c   :  { %v214_v37 = vsub.f32 0.0, %v213_v36 }
 0x39e   :  { %v215_v38 = vmul.f32 1.442695, %v214_v37 }
 0x3a0   :  { %309 = vpow2.f32 %v215_v38 }
 0x3aa   :  { %v310_v39 = vpop.eup %309 }
 0x3ab   :  { %v217_v40 = vadd.f32 1.0, %v310_v39 }
 0x3ad   :  { %311 = vrcp.f32 %v217_v40 }
 0x3b7   :  { %v312_v41 = vpop.eup %311 }
 0x3b8   :  { %v231_v47 = vsub.f32 1.0, %v312_v41  ;;  %v237_v49 = vmul.f32 %v312_v41, %v135_v30 }
 0x40c   :  { %v222_v42 = vpop.permute.xlu1 %221 }
 0x40d   :  { %v224_v43 = vmul.f32 %v312_v41, %v222_v42 }
 0x40f   :  { %226 = vrot.lane.b32.xlu0 %v224_v43, %s318_s1 }
 0x481   :  { %v227_v44 = vpop.permute.xlu0 %226 }
 0x482   :  { %v229_v45 = vadd.f32 %v252_v35, %v227_v44 }
 0x484   :  { %313 = vtanh.f32 %v229_v45 }
 0x48e   :  { %v314_v46 = vpop.eup %313 }
 0x48f   :  { %233 = vrot.lane.b32.xlu1 %v314_v46, %s319_s2 }
 0x501   :  { %v234_v48 = vpop.permute.xlu1 %233 }
 0x502   :  { %v236_v50 = vmul.f32 %v234_v48, %v231_v47 }
 0x504   :  { %v238_v51 = vadd.f32 %v237_v49, %v236_v50 }
 0x506   :  { %240 = vrot.lane.b32.xlu0 %v238_v51, %s319_s2 }
 0x578   :  { %v241_v52 = vpop.permute.xlu0 %240 }
 0x579   :  { %244 = vst.msk [vmem:[%s384_s3] sm:$0x3] %vm18_vm0, %v241_v52 }

// kernel: _lambda_.9
= control target key start
LH: loop header
LB: loop body
LE: loop exit
PB: predicated region body
PF: predicated region fallthrough
CT: control target
= control target key end

     0   :  { %12 = vsyncpa [#allocation3], 0  ;;  %v1156_v3 = vmov 0.0|0.0   ;;  %v1157_v5 = vmov 0.0   ;;  %vm1158_vm0 = vmmov 0   ;;  %s1331_s0 = inlined_call_operand.vmem [shape: f32[2,32], index: 0, kind: input, shape index: {}]   ;;  %s1332_s1 = inlined_call_operand.vmem [shape: f32[8,8], index: 1, kind: input, shape index: {}]   ;;  %s1333_s2 = inlined_call_operand.vmem [shape: f32[32,32], index: 2, kind: input, shape index: {}]   ;;  %s1334_s3 = inlined_call_operand.vmem [shape: f32[8,32], index: 3, kind: input, shape index: {}]   ;;  %s1335_s4 = inlined_call_operand.vmem [shape: f32[8,32], index: 4, kind: input, shape index: {}]   ;;  %s1336_s5 = inlined_call_operand.hbm [shape: f32[2,32], index: 5, kind: output, shape index: {0}]   ;;  %s1337_s6 = inlined_call_operand.hbm [shape: f32[2,32], index: 6, kind: output, shape index: {1}]  }
   0x1   :  { %v27_v0 = vld [vmem:[%s1333_s2] sm:$0xff]  ;;  %v28_v1 = vld [vmem:[%s1333_s2 + $0x8] sm:$0xff]  ;;  %1073 = vmatprep.subr.bf16.mxu0 %v1156_v3  ;;  %1023 = vmatprep.subr.mxu1 %v1157_v5  ;;  %v29_v6 = vld [vmem:[%s1333_s2 + $0x10] sm:$0xff] }
   0x2   :  { %v105_v2 = vld [vmem:[%s1334_s3] sm:$0xff]  ;;  %v1074_v4 = vpack.c.bf16 %v28_v1, %v27_v0  ;;  %v30_v7 = vld [vmem:[%s1333_s2 + $0x18] sm:$0xff]  ;;  %1025 = vmatprep.mubr.msk.f32.mxu1 %vm1158_vm0, %v1157_v5 }
   0x3   :  { %v24_v8 = vld [vmem:[%s1332_s1] sm:$0xff]  ;;  %1024 = vmatpush3.msra.mxu1 %v105_v2 }
   0x4   :  { %1090 = vtanh.f32 %v24_v8 }
   0x5   :  { %13 = vsyncpa [#allocation5], 0  ;;  %1075 = vmatpush3.bf16.msra.mxu0 %v1074_v4  ;;  %v1077_v9 = vpack.c.bf16 %v30_v7, %v29_v6  ;;  %1020 = vmatprep.mubr.msk.f32.mxu0 %vm1158_vm0, %v1157_v5  ;;  %v26_v10 = vld [vmem:[%s1331_s0] sm:$0x3]  ;;  %vm31_vm1 = vcmask 261120   ;;  %vm106_vm2 = vcmask 64512  }
   0x6   :  { %1076 = vmatprep.subr.bf16.mxu0 %v1156_v3  ;;  %1028 = vmatprep.subr.mxu1 %v1157_v5  ;;  %v180_v11 = vld [vmem:[%s1335_s4] sm:$0xff]  ;;  %s1159_s0 = smov 112   ;;  %s1160_s4 = smov 120   ;;  %vm328_vm3 = vcmask 58368   ;;  %vm925_vm4 = vcmask 130048   ;;  %vm927_vm5 = vcmask 195584  }
   0x7   :  { %s1161_s10 = smov 104   ;;  %s1162_s11 = smov 8   ;;  %vm929_vm6 = vcmask 254976  }
   0x8   :  { %s1163_s12 = smov 16   ;;  %s1164_s13 = smov 24  }
   0x9   :  { %1078 = vmatpush3.bf16.msra.mxu0 %v1077_v9  ;;  %s1165_s14 = smov [#allocation2]   ;;  %s1166_s16 = smov [#allocation4]  }
   0xa   :  { %1038 = vmatprep.subr.mxu0 %v1157_v5  ;;  %s950_s15 = sshll.u32 %s1165_s14, 4  ;;  %s960_s17 = sshll.u32 %s1166_s16, 4  ;;  %s951_s15 = int_to_ptr.vmem [resolvable:$true] %s950_s15  ;;  %s961_s17 = int_to_ptr.vmem [resolvable:$true] %s960_s17 }
   0xb   :  { %s1108_s18 = scalar_lea.vmem %s951_s15, 32  ;;  %p1113_p1 = scmp.lt.s32.totalorder %s951_s15, %s951_s15 }
   0xc   :  { %1021 = vmatmul.mubr.msk.f32.vlgmr.msra.gmra.mrb[0].mxu0 %vm31_vm1, %v26_v10  ;;  %p1109_p0 = scmp.ne.s32.totalorder %s951_s15, %s1108_s18  ;;  %p1114_p2 = scmp.lt.s32.totalorder %s1108_s18, %s1108_s18 }
   0xd   :  { %1040 = vmatprep.mubr.msk.f32.mxu0 %vm1158_vm0, %v1157_v5 }
   0xe   :  { %v1091_v12 = vpop.eup %1090  ;;  %p1115_p3 = por %p1114_p2, %p1113_p1 }
   0xf   :  { %1026 = vmatmul.mubr.msk.f32.vlgmr.msra.gmra.mrb[0].mxu1 %vm106_vm2, %v1091_v12 }
  0x10   :  { %1029 = vmatpush3.msra.mxu1 %v180_v11  ;;  %1030 = vmatprep.mubr.msk.f32.mxu1 %vm1158_vm0, %v1157_v5  ;;  %p1116_p4 = pnand %p1115_p3, %p1109_p0 }
  0x11   :  { %1033 = vmatprep.subr.mxu1 %v1157_v5 }
  0x13   :  { %1031 = vmatmul.mubr.msk.f32.vlgmr.msra.gmra.mrb[2].mxu1 %vm106_vm2, %v1091_v12 }
  0x14   :  { %1035 = vmatprep.mubr.msk.f32.mxu1 %vm1158_vm0, %v1157_v5 }
  0xdf   :  { %v101_v13 = vpop.f32.mrb[0].mxu0 }
  0xe0   :  { %v1022_v14 = vpop.f32.mrb[1].mxu0 }
  0xe2   :  { %v176_v15 = vpop.f32.mrb[0].mxu1 }
  0xe3   :  { %582 = vrot.lane.b32.xlu1 %v176_v15, %s1159_s0  ;;  %415 = vrot.lane.b32.xlu0 %v176_v15, %s1160_s4  ;;  %v1027_v16 = vpop.f32.mrb[1].mxu1 }
  0xe4   :  { %1034 = vmatpush3.xpose.msk.msra.mxu1 %vm106_vm2, %v176_v15 }
  0xe5   :  { %1043 = vmatprep.subr.mxu1 %v1157_v5 }
  0xe6   :  { %v1246_v17 = vpop.f32.mrb[2].mxu1 }
  0xe7   :  { %1036 = vmatmul.mubr.msk.f32.vlgmr.msra.gmra.mrb[4].mxu1 %vm106_vm2, %v101_v13  ;;  %580 = vrot.lane.b32.xlu1 %v101_v13, %s1159_s0  ;;  %v1032_v18 = vpop.f32.mrb[3].mxu1 }
  0xe8   :  { %413 = vrot.lane.b32.xlu0 %v101_v13, %s1160_s4  ;;  %1045 = vmatprep.mubr.msk.f32.mxu1 %vm1158_vm0, %v1157_v5 }
  0xe9   :  { %1039 = vmatpush3.msra.mxu0 %v1246_v17 }
  0xea   :  { %1048 = vmatprep.subr.mxu0 %v1157_v5 }
  0xeb   :  { %746 = vrot.lane.b32.xlu1 %v101_v13, %s1161_s10 }
  0xec   :  { %748 = vrot.lane.b32.xlu0 %v176_v15, %s1161_s10 }
 0x155   :  { %v416_v19 = vpop.permute.xlu0 %415  ;;  %v583_v20 = vpop.permute.xlu1 %582 }
 0x156   :  { %1044 = vmatpush3.xpose.msk.msra.mxu1 %vm106_vm2, %v416_v19 }
 0x157   :  { %1053 = vmatprep.subr.mxu1 %v1157_v5 }
 0x159   :  { %v581_v22 = vpop.permute.xlu1 %580 }
 0x15a   :  { %v414_v21 = vpop.permute.xlu0 %413 }
 0x15b   :  { %1046 = vmatmul.mubr.msk.f32.vlgmr.msra.gmra.mrb[6].mxu1 %vm106_vm2, %v414_v21 }
 0x15c   :  { %1054 = vmatpush3.xpose.msk.msra.mxu1 %vm106_vm2, %v583_v20  ;;  %1055 = vmatprep.mubr.msk.f32.mxu1 %vm1158_vm0, %v1157_v5 }
 0x15d   :  { %1063 = vmatprep.subr.mxu1 %v1157_v5  ;;  %v747_v24 = vpop.permute.xlu1 %746 }
 0x15e   :  { %v749_v23 = vpop.permute.xlu0 %748 }
 0x15f   :  { %1056 = vmatmul.mubr.msk.f32.vlgmr.msra.gmra.mrb[8].mxu1 %vm106_vm2, %v581_v22 }
 0x160   :  { %1064 = vmatpush3.xpose.msk.msra.mxu1 %vm106_vm2, %v749_v23  ;;  %1065 = vmatprep.mubr.msk.f32.mxu1 %vm1158_vm0, %v1157_v5 }
 0x163   :  { %1066 = vmatmul.mubr.msk.f32.vlgmr.msra.gmra.mrb[10].mxu1 %vm106_vm2, %v747_v24 }
 0x1ba   :  { %v323_v25 = vpop.f32.mrb[4].mxu1 }
 0x1bb   :  { %v327_v26 = vmul.f32 0.35355338, %v323_v25  ;;  %v1037_v27 = vpop.f32.mrb[5].mxu1 }
 0x1bd   :  { %v329_v28 = vsel %vm328_vm3, %v327_v26, -inf }
 0x1be   :  { %330 = vmax.xlane.f32.xlu0 %v329_v28 }
 0x22e   :  { %v487_v29 = vpop.f32.mrb[6].mxu1 }
 0x22f   :  { %v491_v30 = vmul.f32 0.35355338, %v487_v29  ;;  %v1047_v31 = vpop.f32.mrb[7].mxu1 }
 0x231   :  { %v492_v32 = vsel %vm328_vm3, %v491_v30, -inf }
 0x232   :  { %493 = vmax.xlane.f32.xlu1 %v492_v32  ;;  %v654_v33 = vpop.f32.mrb[8].mxu1 }
 0x233   :  { %v658_v34 = vmul.f32 0.35355338, %v654_v33  ;;  %v1057_v35 = vpop.f32.mrb[9].mxu1 }
 0x235   :  { %v659_v36 = vsel %vm328_vm3, %v658_v34, -inf }
 0x236   :  { %660 = vmax.xlane.f32.xlu0 %v659_v36  ;;  %v820_v37 = vpop.f32.mrb[10].mxu1 }
 0x237   :  { %v824_v38 = vmul.f32 0.35355338, %v820_v37  ;;  %v1067_v39 = vpop.f32.mrb[11].mxu1 }
 0x239   :  { %v825_v40 = vsel %vm328_vm3, %v824_v38, -inf }
 0x23a   :  { %826 = vmax.xlane.f32.xlu0 %v825_v40 }
 0x243   :  { %504 = vrot.lane.b32.xlu1 %v1246_v17, %s1160_s4 }
 0x24b   :  { %v331_v41 = vpop.xlane.xlu0 %330 }
 0x24c   :  { %v332_v42 = vsub.f32 %v327_v26, %v331_v41 }
 0x24e   :  { %v333_v43 = vmul.f32 1.442695, %v332_v42 }
 0x250   :  { %1092 = vpow2.f32 %v333_v43 }
 0x25a   :  { %v1093_v44 = vpop.eup %1092 }
 0x25b   :  { %v335_v45 = vsel %vm328_vm3, %v1093_v44, 0.0 }
 0x267   :  { %336 = vadd.xlane.f32.xlu1 %v335_v45 }
 0x2bf   :  { %v494_v46 = vpop.xlane.xlu1 %493 }
 0x2c0   :  { %v495_v47 = vsub.f32 %v491_v30, %v494_v46 }
 0x2c2   :  { %v496_v48 = vmul.f32 1.442695, %v495_v47 }
 0x2c3   :  { %v661_v49 = vpop.xlane.xlu0 %660  ;;  %v505_v61 = vpop.permute.xlu1 %504 }
 0x2c4   :  { %1094 = vpow2.f32 %v496_v48  ;;  %v662_v50 = vsub.f32 %v658_v34, %v661_v49 }
 0x2c6   :  { %v663_v51 = vmul.f32 1.442695, %v662_v50 }
 0x2c7   :  { %v827_v52 = vpop.xlane.xlu0 %826 }
 0x2c8   :  { %1096 = vpow2.f32 %v663_v51  ;;  %v828_v53 = vsub.f32 %v824_v38, %v827_v52 }
 0x2ca   :  { %v829_v54 = vmul.f32 1.442695, %v828_v53 }
 0x2cc   :  { %1098 = vpow2.f32 %v829_v54 }
 0x2ce   :  { %v1095_v55 = vpop.eup %1094 }
 0x2cf   :  { %v498_v56 = vsel %vm328_vm3, %v1095_v55, 0.0 }
 0x2d0   :  { %499 = vadd.xlane.f32.xlu0 %v498_v56 }
 0x2d2   :  { %v1097_v57 = vpop.eup %1096 }
 0x2d3   :  { %v665_v58 = vsel %vm328_vm3, %v1097_v57, 0.0 }
 0x2d4   :  { %666 = vadd.xlane.f32.xlu1 %v665_v58 }
 0x2d6   :  { %v1099_v59 = vpop.eup %1098 }
 0x2d7   :  { %v831_v60 = vsel %vm328_vm3, %v1099_v59, 0.0 }
 0x2d8   :  { %832 = vadd.xlane.f32.xlu0 %v831_v60 }
 0x2e5   :  { %836 = vrot.lane.b32.xlu1 %v1246_v17, %s1161_s10 }
 0x2ee   :  { %670 = vrot.lane.b32.xlu0 %v1246_v17, %s1159_s0 }
 0x2f4   :  { %v337_v62 = vpop.xlane.xlu1 %336 }
 0x2f5   :  { %1100 = vrcp.f32 %v337_v62 }
 0x2ff   :  { %v1101_v63 = vpop.eup %1100 }
 0x300   :  { %v1283_v0 = vmul.f32 %v1101_v63, %v1093_v44 }
 0x302   :  { %1041 = vmatmul.mubr.msk.f32.vlgmr.msra.gmra.mrb[2].mxu0 %vm106_vm2, %v1283_v0 }
 0x303   :  { %1049 = vmatpush3.msra.mxu0 %v505_v61  ;;  %1050 = vmatprep.mubr.msk.f32.mxu0 %vm1158_vm0, %v1157_v5 }
 0x304   :  { %1058 = vmatprep.subr.mxu0 %v1157_v5 }
 0x35d   :  { %v500_v1 = vpop.xlane.xlu0 %499 }
 0x35e   :  { %1102 = vrcp.f32 %v500_v1 }
 0x361   :  { %v667_v2 = vpop.xlane.xlu1 %666 }
 0x362   :  { %1104 = vrcp.f32 %v667_v2 }
 0x365   :  { %v833_v3 = vpop.xlane.xlu0 %832  ;;  %v837_v10 = vpop.permute.xlu1 %836 }
 0x366   :  { %1106 = vrcp.f32 %v833_v3 }
 0x368   :  { %v1103_v4 = vpop.eup %1102 }
 0x369   :  { %v671_v6 = vpop.permute.xlu0 %670  ;;  %v502_v7 = vmul.f32 %v1103_v4, %v1095_v55 }
 0x36b   :  { %931 = vrot.lane.b32.xlu0 %v502_v7, %s1162_s11  ;;  %1051 = vmatmul.mubr.msk.f32.vlgmr.msra.gmra.mrb[4].mxu0 %vm106_vm2, %v502_v7 }
 0x36c   :  { %v1105_v8 = vpop.eup %1104  ;;  %1059 = vmatpush3.msra.mxu0 %v671_v6  ;;  %1060 = vmatprep.mubr.msk.f32.mxu0 %vm1158_vm0, %v1157_v5 }
 0x36d   :  { %v669_v9 = vmul.f32 %v1105_v8, %v1097_v57  ;;  %1068 = vmatprep.subr.mxu0 %v1157_v5 }
 0x36f   :  { %1061 = vmatmul.mubr.msk.f32.vlgmr.msra.gmra.mrb[6].mxu0 %vm106_vm2, %v669_v9 }
 0x370   :  { %v1107_v11 = vpop.eup %1106  ;;  %1069 = vmatpush3.msra.mxu0 %v837_v10  ;;  %1070 = vmatprep.mubr.msk.f32.mxu0 %vm1158_vm0, %v1157_v5 }
 0x371   :  { %v835_v12 = vmul.f32 %v1107_v11, %v1099_v59 }
 0x373   :  { %1071 = vmatmul.mubr.msk.f32.vlgmr.msra.gmra.mrb[8].mxu0 %vm106_vm2, %v835_v12 }
 0x3d5   :  { %v409_v13 = vpop.f32.mrb[2].mxu0 }
 0x3d6   :  { %v1042_v14 = vpop.f32.mrb[3].mxu0 }
 0x3dd   :  { %v932_v21 = vpop.permute.xlu0 %931 }
 0x43e   :  { %v576_v15 = vpop.f32.mrb[4].mxu0 }
 0x43f   :  { %913 = vrot.lane.b32.xlu1 %v576_v15, %s1162_s11  ;;  %v1052_v16 = vpop.f32.mrb[5].mxu0 }
 0x442   :  { %v742_v17 = vpop.f32.mrb[6].mxu0 }
 0x443   :  { %917 = vrot.lane.b32.xlu0 %v742_v17, %s1163_s12  ;;  %v1062_v18 = vpop.f32.mrb[7].mxu0 }
 0x446   :  { %v908_v19 = vpop.f32.mrb[8].mxu0 }
 0x447   :  { %937 = vrot.lane.b32.xlu0 %v835_v12, %s1164_s13  ;;  %921 = vrot.lane.b32.xlu1 %v908_v19, %s1164_s13  ;;  %v1072_v20 = vpop.f32.mrb[9].mxu0 }
 0x44b   :  { %934 = vrot.lane.b32.xlu1 %v669_v9, %s1163_s12 }
 0x4b1   :  { %v914_v5 = vpop.permute.xlu1 %913 }
 0x4b2   :  { %v924_v23 = vsel %vm106_vm2, %v409_v13, %v914_v5 }
 0x4b5   :  { %v918_v22 = vpop.permute.xlu0 %917 }
 0x4b6   :  { %v926_v24 = vsel %vm925_vm4, %v924_v23, %v918_v22 }
 0x4b9   :  { %v922_v25 = vpop.permute.xlu1 %921 }
 0x4ba   :  { %v928_v26 = vsel %vm927_vm5, %v926_v24, %v922_v25 }
 0x4bb   :  { %930 = vst.msk [vmem:[#allocation2] sm:$0x3] %vm929_vm6, %v928_v26 }
 0x4bc   :  { %1119 = shalt.err (!%p1116_p4)
}
 0x4bd   :  { %s1120_s21 = scalar_lea.hbm %s1336_s5, 32 }
 0x4be   :  { %p1121_p5 = scmp.ne.s32.totalorder %s1336_s5, %s1120_s21  ;;  %p1124_p6 = scmp.lt.u32.totalorder %s1120_s21, %s1336_s5 }
 0x4c0   :  { %p1126_p7 = pnand %p1124_p6, %p1121_p5 }
 0x4c2   :  { %1129 = shalt.err (!%p1126_p7)
}
 0x4c3   :  { %953 = dma.vmem_to_hbm [thread:$0]  %s951_s15, 32, %s1336_s5, [#allocation3]   ;;  %v940_v27 = vsel %vm106_vm2, %v1283_v0, %v932_v21  ;;  %v935_v28 = vpop.permute.xlu1 %934  ;;  %v938_v29 = vpop.permute.xlu0 %937 }
 0x4c4   :  { %v941_v30 = vsel %vm925_vm4, %v940_v27, %v935_v28  ;;  %s1130_s28 = scalar_lea.vmem %s961_s17, 32  ;;  %p1135_p9 = scmp.lt.s32.totalorder %s961_s17, %s961_s17 }
 0x4c5   :  { %v942_v31 = vsel %vm927_vm5, %v941_v30, %v938_v29  ;;  %p1131_p8 = scmp.ne.s32.totalorder %s961_s17, %s1130_s28  ;;  %p1136_p10 = scmp.lt.s32.totalorder %s1130_s28, %s1130_s28 }
 0x4c6   :  { %943 = vst.msk [vmem:[#allocation4] sm:$0x3] %vm929_vm6, %v942_v31 }
 0x4c7   :  { %p1137_p11 = por %p1136_p10, %p1135_p9 }
 0x4c9   :  { %p1138_p12 = pnand %p1137_p11, %p1131_p8 }
 0x4cb   :  { %1141 = shalt.err (!%p1138_p12)
}
 0x4cc   :  { %s1142_s30 = scalar_lea.hbm %s1337_s6, 32 }
 0x4cd   :  { %p1143_p13 = scmp.ne.s32.totalorder %s1337_s6, %s1142_s30  ;;  %p1146_p0 = scmp.lt.u32.totalorder %s1142_s30, %s1337_s6 }
 0x4cf   :  { %p1148_p1 = pnand %p1146_p0, %p1143_p13 }
 0x4d1   :  { %1151 = shalt.err (!%p1148_p1)
}
 0x4d2   :  { %963 = dma.vmem_to_hbm [thread:$0]  %s961_s17, 32, %s1337_s6, [#allocation5]  }
 0x4d3   :  { %1152 = dma.done.wait [#allocation3], 32  }
 0x4d4   :  { %1153 = vsyncadd [#allocation3], 4294967264 }
 0x4d5   :  { %1154 = dma.done.wait [#allocation5], 32  }
 0x4d6   :  { %1155 = vsyncadd [#allocation5], 4294967264 }
 0x4d7   :  { %970 = vsyncpa [#allocation3], 1 }
 0x4d8   :  { %971 = vsyncpa [#allocation5], 1 }

</bundles_post_ra>
